<compile_context>
chip_gen: v6e
topology: v6e:2x2x1
jax: 0.10.0
libtpu: 0.0.40
codegen_flags: <defaults>
</compile_context>

<pallas_src>
import functools

import jax
import jax.numpy as jnp
from jax.experimental import pallas as pl
from jax.experimental.pallas import tpu as pltpu


# Fixed geometry of the Actor trunk.
_H0, _W0, _C0 = 32, 32, 6           # input feature map
_H1, _W1, _C1 = 16, 16, 16          # after conv1
_H2, _W2, _C2 = 8, 8, 16            # after conv2
_K, _STRIDE, _PAD = 5, 2, 2
_FC1 = 128
_NPAD = 128                         # fc2 output zero-padded to a full lane tile

_LANES0 = _W0 * _C0                 # 192  (lane = w*C0 + c)
_LANES1 = _W1 * _C1                 # 256  (lane = w*C1 + c)
_LANES2 = _W2 * _C2                 # 128  (lane = w*C2 + c)

_NROWS = (_H0 + 2 * _PAD) // 4      # 9 row groups after the mod-4 row split
_TILE_B_MAX = 128                   # max batch rows per grid step


# ---------------------------------------------------------------------------
# Kernel: whole Actor forward for one batch tile, entirely in VMEM.
# ---------------------------------------------------------------------------
def _actor_kernel(x_ref, a_ref, b_ref, wf1_ref, wf2_ref,
                  bc1_ref, bc2_ref, bf1_ref, bf2_ref,
                  o_ref, pad_ref, *, tb, max_action):
    f32 = jnp.float32
    bf16 = jnp.bfloat16

    def dot(a, b):
        # bf16 x bf16 -> f32 accumulation on the MXU.
        return jnp.dot(a, b, preferred_element_type=f32)

    # ---- conv1: 10 matmuls against band matrices A_i -----------------------
    # x_ref: [tb, 4, 9, 192] holds the row-padded input split by row % 4, so
    # plane1(p, a) = padded rows 4*m + p, m = a..a+7, for every sample.
    def plane1(p, a):
        return x_ref[:, p, a:a + 8, :].reshape(tb * 8, _LANES0).astype(bf16)

    # Distinct planes are cast to bf16 exactly once and reused across taps.
    p00 = plane1(0, 0); p10 = plane1(1, 0); p20 = plane1(2, 0); p30 = plane1(3, 0)
    p01 = plane1(0, 1); p11 = plane1(1, 1); p21 = plane1(2, 1)

    # even conv1 output rows (oh = 0, 2, ..., 14): padded rows 4m + i
    he = (dot(p00, a_ref[0]) + dot(p10, a_ref[1]) + dot(p20, a_ref[2]) +
          dot(p30, a_ref[3]) + dot(p01, a_ref[4]))
    # odd conv1 output rows (oh = 1, 3, ..., 15): padded rows 4m + 2 + i
    ho = (dot(p20, a_ref[0]) + dot(p30, a_ref[1]) + dot(p01, a_ref[2]) +
          dot(p11, a_ref[3]) + dot(p21, a_ref[4]))

    bc1 = bc1_ref[...]
    he = jnp.maximum(he + bc1, 0.0).reshape(tb, 8, _LANES1)
    ho = jnp.maximum(ho + bc1, 0.0).reshape(tb, 8, _LANES1)

    # ---- conv2 input: row-pad conv1 output (parity split) in VMEM scratch ---
    # pad_ref: [tb, 2, 10, 256]; plane p holds the parity-p rows of the
    # zero-row-padded conv2 input.  Rows 1..8 are fully rewritten each step;
    # only the boundary rows 0 and 9 (spatial padding) need explicit zeros.
    zrow = jnp.zeros((tb, 2, 1, _LANES1), f32)
    pad_ref[:, :, 0:1, :] = zrow
    pad_ref[:, :, 9:10, :] = zrow
    pad_ref[:, 0, 1:9, :] = he
    pad_ref[:, 1, 1:9, :] = ho

    # ---- conv2: 5 matmuls against band matrices B_i -------------------------
    def plane2(p, a):
        return pad_ref[:, p, a:a + 8, :].reshape(tb * 8, _LANES1).astype(bf16)

    c2 = (dot(plane2(0, 0), b_ref[0]) + dot(plane2(1, 0), b_ref[1]) +
          dot(plane2(0, 1), b_ref[2]) + dot(plane2(1, 1), b_ref[3]) +
          dot(plane2(0, 2), b_ref[4]))
    c2 = jnp.maximum(c2 + bc2_ref[...], 0.0)                   # [tb*8, 128] f32
    c2b = c2.astype(bf16).reshape(tb, 8, _LANES2)

    # ---- fc1 (K blocked over the 8 conv2 output rows) + ReLU ----------------
    h = dot(c2b[:, 0, :], wf1_ref[0])
    for r in range(1, _H2):
        h = h + dot(c2b[:, r, :], wf1_ref[r])
    h = jnp.maximum(h + bf1_ref[...], 0.0)                     # [tb, 128] f32

    # ---- fc2 epilogue (zero-padded to 128 lanes) + tanh + scale -------------
    y = dot(h.astype(bf16), wf2_ref[...]) + bf2_ref[...]
    o_ref[...] = (max_action * jnp.tanh(y)).astype(o_ref.dtype)


# ---------------------------------------------------------------------------
# One-time parameter preparation (init-time, plain JAX).
# ---------------------------------------------------------------------------
def _conv_band_mats(w, in_w, out_w, stride, pad):
    """w: [kh, kw, cin, cout] -> [kh, in_w*cin, out_w*cout] band matrices.

    mats[i, c*cin + d, ow*cout + o] = w[i, j, d, o] where c = stride*ow + j - pad;
    entries whose source column falls in the zero padding stay 0.
    """
    kh, kw, cin, cout = w.shape
    cols = jnp.arange(in_w)
    ows = jnp.arange(out_w)
    mats = jnp.zeros((kh, in_w * cin, out_w * cout), jnp.float32)
    for j in range(kw):
        sel = (cols[:, None] == (stride * ows[None, :] + j - pad))
        contrib = jnp.einsum('cw,ido->icdwo', sel.astype(jnp.float32),
                             w[:, j].astype(jnp.float32))
        mats = mats + contrib.reshape(kh, in_w * cin, out_w * cout)
    return mats


def make_actor_params(action_dim, key):
    ks = jax.random.split(key, 8)
    s = 0.05
    return {
        "conv1_w": s * jax.random.normal(ks[0], (5, 5, _C0, _C1), jnp.float32),
        "conv1_b": s * jax.random.normal(ks[1], (_C1,), jnp.float32),
        "conv2_w": s * jax.random.normal(ks[2], (5, 5, _C1, _C2), jnp.float32),
        "conv2_b": s * jax.random.normal(ks[3], (_C2,), jnp.float32),
        "fc1_w": s * jax.random.normal(ks[4], (_H2 * _W2 * _C2, _FC1), jnp.float32),
        "fc1_b": s * jax.random.normal(ks[5], (_FC1,), jnp.float32),
        "fc2_w": s * jax.random.normal(ks[6], (_FC1, action_dim), jnp.float32),
        "fc2_b": s * jax.random.normal(ks[7], (action_dim,), jnp.float32),
    }


def prepare_actor_params(params, action_dim):
    """Build kernel-ready operands (bf16 band matrices / FC weights, f32 biases)."""
    # NOTE: fc1_w is assumed to be laid out for NHWC flattening (row = h,
    # lane = w*C2 + c).  A real PyTorch (NCHW-flatten) checkpoint would need a
    # (C,H,W)->(H,W,C) permutation of its fc1 input dimension first.
    bf16 = jnp.bfloat16
    wf2 = jnp.zeros((_FC1, _NPAD), jnp.float32).at[:, :action_dim].set(params["fc2_w"])
    bf2 = jnp.zeros((1, _NPAD), jnp.float32).at[0, :action_dim].set(params["fc2_b"])
    return {
        "a_mats": _conv_band_mats(params["conv1_w"], _W0, _W1, _STRIDE, _PAD).astype(bf16),
        "b_mats": _conv_band_mats(params["conv2_w"], _W1, _W2, _STRIDE, _PAD).astype(bf16),
        "wf1": params["fc1_w"].reshape(_H2, _W2 * _C2, _FC1).astype(bf16),
        "wf2": wf2.astype(bf16),
        "bc1": jnp.tile(params["conv1_b"], _W1).reshape(1, _LANES1),
        "bc2": jnp.tile(params["conv2_b"], _W2).reshape(1, _LANES2),
        "bf1": params["fc1_b"].reshape(1, _FC1),
        "bf2": bf2,
    }


# ---------------------------------------------------------------------------
# Forward wrapper: one fused pallas_call, grid tiled over batch.
# ---------------------------------------------------------------------------
def _choose_tile(batch):
    """Pick a batch tile: big enough to feed the MXU, but keep >=2 grid steps
    (for v7x megacore) once the batch is large enough to afford it."""
    if batch <= 8:
        return batch, batch
    tb = min(_TILE_B_MAX, ((batch + 1) // 2 + 7) // 8 * 8)
    tb = max(8, tb)
    bp = ((batch + tb - 1) // tb) * tb
    return tb, bp


def actor_forward(kp, x, *, max_action, action_dim):
    """x: [B, 32*32*6] float32 -> actions [B, action_dim]."""
    B = x.shape[0]
    tb, bp = _choose_tile(B)

    # Light input prep (no im2col, ~1.1x expansion): lanes = w*C0 + c,
    # zero-pad H by 2 each side, split rows by residue mod 4 so every conv1
    # row tap is a contiguous slice inside the kernel.
    xr = x.reshape(B, _H0, _LANES0)
    xp = jnp.pad(xr, ((0, 0), (_PAD, _PAD), (0, 0)))                 # [B, 36, 192]
    planes = xp.reshape(B, _NROWS, 4, _LANES0).transpose(0, 2, 1, 3)  # [B, 4, 9, 192]
    if bp != B:
        planes = jnp.pad(planes, ((0, bp - B), (0, 0), (0, 0), (0, 0)))

    kernel = functools.partial(_actor_kernel, tb=tb, max_action=float(max_action))

    # Advisory cost estimate (as-implemented band-matmul flops).
    flops_per_sample = 2 * (10 * 8 * _LANES0 * _LANES1
                            + 5 * 8 * _LANES1 * _LANES2
                            + _H2 * _LANES2 * _FC1
                            + _FC1 * _NPAD)
    weight_bytes = 2 * (_K * _LANES0 * _LANES1 + _K * _LANES1 * _LANES2
                        + _H2 * _LANES2 * _FC1 + _FC1 * _NPAD)
    cost = pl.CostEstimate(
        flops=flops_per_sample * bp,
        transcendentals=bp * _NPAD,
        bytes_accessed=bp * (4 * _NROWS * _LANES0 * 4 + _NPAD * 4) + weight_bytes)

    out = pl.pallas_call(
        kernel,
        out_shape=jax.ShapeDtypeStruct((bp, _NPAD), jnp.float32),
        grid=(bp // tb,),
        in_specs=[
            pl.BlockSpec((tb, 4, _NROWS, _LANES0), lambda i: (i, 0, 0, 0)),
            pl.BlockSpec((_K, _LANES0, _LANES1), lambda i: (0, 0, 0)),
            pl.BlockSpec((_K, _LANES1, _LANES2), lambda i: (0, 0, 0)),
            pl.BlockSpec((_H2, _LANES2, _FC1), lambda i: (0, 0, 0)),
            pl.BlockSpec((_FC1, _NPAD), lambda i: (0, 0)),
            pl.BlockSpec((1, _LANES1), lambda i: (0, 0)),
            pl.BlockSpec((1, _LANES2), lambda i: (0, 0)),
            pl.BlockSpec((1, _FC1), lambda i: (0, 0)),
            pl.BlockSpec((1, _NPAD), lambda i: (0, 0)),
        ],
        out_specs=pl.BlockSpec((tb, _NPAD), lambda i: (i, 0)),
        scratch_shapes=[pltpu.VMEM((tb, 2, _H1 // 2 + 2, _LANES1), jnp.float32)],
        compiler_params=pltpu.CompilerParams(
            dimension_semantics=("parallel",),
            vmem_limit_bytes=48 * 1024 * 1024),
        cost_estimate=cost,
    )(planes, kp["a_mats"], kp["b_mats"], kp["wf1"], kp["wf2"],
      kp["bc1"], kp["bc2"], kp["bf1"], kp["bf2"])

    return out[:B, :action_dim]


# ---------------------------------------------------------------------------
# Pure-JAX reference (for validation only).
# ---------------------------------------------------------------------------
def actor_reference(params, x, max_action):
    B = x.shape[0]
    h = x.reshape(B, _H0, _W0, _C0)
    h = jax.lax.conv_general_dilated(
        h, params["conv1_w"], (_STRIDE, _STRIDE), ((_PAD, _PAD), (_PAD, _PAD)),
        dimension_numbers=("NHWC", "HWIO", "NHWC"))
    h = jax.nn.relu(h + params["conv1_b"])
    h = jax.lax.conv_general_dilated(
        h, params["conv2_w"], (_STRIDE, _STRIDE), ((_PAD, _PAD), (_PAD, _PAD)),
        dimension_numbers=("NHWC", "HWIO", "NHWC"))
    h = jax.nn.relu(h + params["conv2_b"])
    h = h.reshape(B, _H2 * _W2 * _C2)
    h = jax.nn.relu(h @ params["fc1_w"] + params["fc1_b"])
    return max_action * jnp.tanh(h @ params["fc2_w"] + params["fc2_b"])


if __name__ == "__main__":
    key = jax.random.PRNGKey(0)
    k_param, k_x, k_x2 = jax.random.split(key, 3)

    action_dim = 4
    max_action = 2.0
    batch = 2
    state_dim = _H0 * _W0 * _C0

    params = make_actor_params(action_dim, k_param)
    kparams = prepare_actor_params(params, action_dim)

    fwd = jax.jit(functools.partial(
        actor_forward, max_action=max_action, action_dim=action_dim))

    # --- small-batch check (module-sized example) ---
    x = jax.random.normal(k_x, (batch, state_dim), jnp.float32)
    out = fwd(kparams, x)
    jax.block_until_ready(out)
    assert out.shape == (batch, action_dim)
    assert bool(jnp.all(jnp.abs(out) <= max_action))
    ref = actor_reference(params, x, max_action)
    err = float(jnp.max(jnp.abs(out - ref)))
    assert err < 5e-2, f"mismatch vs reference (small batch): {err}"

    # --- larger batch exercises the tiled (multi-step grid) fast path ---
    x2 = jax.random.normal(k_x2, (64, state_dim), jnp.float32)
    out2 = fwd(kparams, x2)
    jax.block_until_ready(out2)
    assert out2.shape == (64, action_dim)
    ref2 = actor_reference(params, x2, max_action)
    err2 = float(jnp.max(jnp.abs(out2 - ref2)))
    assert err2 < 7.5e-2, f"mismatch vs reference (tiled batch): {err2}"

    print("KERNEL_OK")
</pallas_src>

<mosaic_0001>
module attributes {stable_mosaic.version = 11 : i64} {
  func.func @_actor_kernel(%arg0: i32, %arg1: memref<2x4x9x192xf32, #tpu.memory_space<vmem>>, %arg2: memref<5x192x256xbf16, #tpu.memory_space<vmem>>, %arg3: memref<5x256x128xbf16, #tpu.memory_space<vmem>>, %arg4: memref<8x128x128xbf16, #tpu.memory_space<vmem>>, %arg5: memref<128x128xbf16, #tpu.memory_space<vmem>>, %arg6: memref<1x256xf32, #tpu.memory_space<vmem>>, %arg7: memref<1x128xf32, #tpu.memory_space<vmem>>, %arg8: memref<1x128xf32, #tpu.memory_space<vmem>>, %arg9: memref<1x128xf32, #tpu.memory_space<vmem>>, %arg10: memref<2x128xf32, #tpu.memory_space<vmem>>, %arg11: memref<2x2x10x256xf32, #tpu.memory_space<vmem>>) attributes {dimension_semantics = [#tpu.dimension_semantics<parallel>], iteration_bounds = array<i64: 1>, scalar_prefetch = 0 : i64, scratch_operands = 1 : i64, tpu.core_type = #tpu.core_type<tc>, window_params = [{transform_indices = @transform_0, window_bounds = array<i64: 2, 4, 9, 192>}, {pipeline_mode = #tpu.pipeline_mode<synchronous>, transform_indices = @transform_1, window_bounds = array<i64: 5, 192, 256>}, {pipeline_mode = #tpu.pipeline_mode<synchronous>, transform_indices = @transform_2, window_bounds = array<i64: 5, 256, 128>}, {pipeline_mode = #tpu.pipeline_mode<synchronous>, transform_indices = @transform_3, window_bounds = array<i64: 8, 128, 128>}, {pipeline_mode = #tpu.pipeline_mode<synchronous>, transform_indices = @transform_4, window_bounds = array<i64: 128, 128>}, {pipeline_mode = #tpu.pipeline_mode<synchronous>, transform_indices = @transform_5, window_bounds = array<i64: 1, 256>}, {pipeline_mode = #tpu.pipeline_mode<synchronous>, transform_indices = @transform_6, window_bounds = array<i64: 1, 128>}, {pipeline_mode = #tpu.pipeline_mode<synchronous>, transform_indices = @transform_7, window_bounds = array<i64: 1, 128>}, {pipeline_mode = #tpu.pipeline_mode<synchronous>, transform_indices = @transform_8, window_bounds = array<i64: 1, 128>}, {transform_indices = @transform_9, window_bounds = array<i64: 2, 128>}]} {
    %c0 = arith.constant 0 : index
    %c0_0 = arith.constant 0 : index
    %c0_1 = arith.constant 0 : index
    %c0_2 = arith.constant 0 : index
    %0 = vector.load %arg1[%c0, %c0_0, %c0_1, %c0_2] : memref<2x4x9x192xf32, #tpu.memory_space<vmem>>, vector<2x1x8x192xf32>
    %1 = vector.shape_cast %0 : vector<2x1x8x192xf32> to vector<2x8x192xf32>
    %2 = vector.shape_cast %1 : vector<2x8x192xf32> to vector<16x192xf32>
    %3 = arith.truncf %2 : vector<16x192xf32> to vector<16x192xbf16>
    %c0_3 = arith.constant 0 : index
    %c1 = arith.constant 1 : index
    %c0_4 = arith.constant 0 : index
    %c0_5 = arith.constant 0 : index
    %4 = vector.load %arg1[%c0_3, %c1, %c0_4, %c0_5] : memref<2x4x9x192xf32, #tpu.memory_space<vmem>>, vector<2x1x8x192xf32>
    %5 = vector.shape_cast %4 : vector<2x1x8x192xf32> to vector<2x8x192xf32>
    %6 = vector.shape_cast %5 : vector<2x8x192xf32> to vector<16x192xf32>
    %7 = arith.truncf %6 : vector<16x192xf32> to vector<16x192xbf16>
    %c0_6 = arith.constant 0 : index
    %c2 = arith.constant 2 : index
    %c0_7 = arith.constant 0 : index
    %c0_8 = arith.constant 0 : index
    %8 = vector.load %arg1[%c0_6, %c2, %c0_7, %c0_8] : memref<2x4x9x192xf32, #tpu.memory_space<vmem>>, vector<2x1x8x192xf32>
    %9 = vector.shape_cast %8 : vector<2x1x8x192xf32> to vector<2x8x192xf32>
    %10 = vector.shape_cast %9 : vector<2x8x192xf32> to vector<16x192xf32>
    %11 = arith.truncf %10 : vector<16x192xf32> to vector<16x192xbf16>
    %c0_9 = arith.constant 0 : index
    %c3 = arith.constant 3 : index
    %c0_10 = arith.constant 0 : index
    %c0_11 = arith.constant 0 : index
    %12 = vector.load %arg1[%c0_9, %c3, %c0_10, %c0_11] : memref<2x4x9x192xf32, #tpu.memory_space<vmem>>, vector<2x1x8x192xf32>
    %13 = vector.shape_cast %12 : vector<2x1x8x192xf32> to vector<2x8x192xf32>
    %14 = vector.shape_cast %13 : vector<2x8x192xf32> to vector<16x192xf32>
    %15 = arith.truncf %14 : vector<16x192xf32> to vector<16x192xbf16>
    %c0_12 = arith.constant 0 : index
    %c0_13 = arith.constant 0 : index
    %c1_14 = arith.constant 1 : index
    %c0_15 = arith.constant 0 : index
    %16 = vector.load %arg1[%c0_12, %c0_13, %c1_14, %c0_15] : memref<2x4x9x192xf32, #tpu.memory_space<vmem>>, vector<2x1x8x192xf32>
    %17 = vector.shape_cast %16 : vector<2x1x8x192xf32> to vector<2x8x192xf32>
    %18 = vector.shape_cast %17 : vector<2x8x192xf32> to vector<16x192xf32>
    %19 = arith.truncf %18 : vector<16x192xf32> to vector<16x192xbf16>
    %c0_16 = arith.constant 0 : index
    %c1_17 = arith.constant 1 : index
    %c1_18 = arith.constant 1 : index
    %c0_19 = arith.constant 0 : index
    %20 = vector.load %arg1[%c0_16, %c1_17, %c1_18, %c0_19] : memref<2x4x9x192xf32, #tpu.memory_space<vmem>>, vector<2x1x8x192xf32>
    %21 = vector.shape_cast %20 : vector<2x1x8x192xf32> to vector<2x8x192xf32>
    %22 = vector.shape_cast %21 : vector<2x8x192xf32> to vector<16x192xf32>
    %23 = arith.truncf %22 : vector<16x192xf32> to vector<16x192xbf16>
    %c0_20 = arith.constant 0 : index
    %c2_21 = arith.constant 2 : index
    %c1_22 = arith.constant 1 : index
    %c0_23 = arith.constant 0 : index
    %24 = vector.load %arg1[%c0_20, %c2_21, %c1_22, %c0_23] : memref<2x4x9x192xf32, #tpu.memory_space<vmem>>, vector<2x1x8x192xf32>
    %25 = vector.shape_cast %24 : vector<2x1x8x192xf32> to vector<2x8x192xf32>
    %26 = vector.shape_cast %25 : vector<2x8x192xf32> to vector<16x192xf32>
    %27 = arith.truncf %26 : vector<16x192xf32> to vector<16x192xbf16>
    %c0_24 = arith.constant 0 : index
    %c0_25 = arith.constant 0 : index
    %c0_26 = arith.constant 0 : index
    %28 = vector.load %arg2[%c0_24, %c0_25, %c0_26] : memref<5x192x256xbf16, #tpu.memory_space<vmem>>, vector<1x192x256xbf16>
    %29 = vector.shape_cast %28 : vector<1x192x256xbf16> to vector<192x256xbf16>
    %cst = arith.constant dense<0.000000e+00> : vector<16x256xf32>
    %30 = tpu.matmul %3, %29, %cst {dimension_numbers = #tpu.dot_dimension_numbers<[1], [0], [0], [1], [0, 0, 1, 1], [], []>} : vector<16x192xbf16>, vector<192x256xbf16>, vector<16x256xf32> -> vector<16x256xf32>
    %c1_27 = arith.constant 1 : index
    %c0_28 = arith.constant 0 : index
    %c0_29 = arith.constant 0 : index
    %31 = vector.load %arg2[%c1_27, %c0_28, %c0_29] : memref<5x192x256xbf16, #tpu.memory_space<vmem>>, vector<1x192x256xbf16>
    %32 = vector.shape_cast %31 : vector<1x192x256xbf16> to vector<192x256xbf16>
    %cst_30 = arith.constant dense<0.000000e+00> : vector<16x256xf32>
    %33 = tpu.matmul %7, %32, %cst_30 {dimension_numbers = #tpu.dot_dimension_numbers<[1], [0], [0], [1], [0, 0, 1, 1], [], []>} : vector<16x192xbf16>, vector<192x256xbf16>, vector<16x256xf32> -> vector<16x256xf32>
    %34 = arith.addf %30, %33 : vector<16x256xf32>
    %c2_31 = arith.constant 2 : index
    %c0_32 = arith.constant 0 : index
    %c0_33 = arith.constant 0 : index
    %35 = vector.load %arg2[%c2_31, %c0_32, %c0_33] : memref<5x192x256xbf16, #tpu.memory_space<vmem>>, vector<1x192x256xbf16>
    %36 = vector.shape_cast %35 : vector<1x192x256xbf16> to vector<192x256xbf16>
    %cst_34 = arith.constant dense<0.000000e+00> : vector<16x256xf32>
    %37 = tpu.matmul %11, %36, %cst_34 {dimension_numbers = #tpu.dot_dimension_numbers<[1], [0], [0], [1], [0, 0, 1, 1], [], []>} : vector<16x192xbf16>, vector<192x256xbf16>, vector<16x256xf32> -> vector<16x256xf32>
    %38 = arith.addf %34, %37 : vector<16x256xf32>
    %c3_35 = arith.constant 3 : index
    %c0_36 = arith.constant 0 : index
    %c0_37 = arith.constant 0 : index
    %39 = vector.load %arg2[%c3_35, %c0_36, %c0_37] : memref<5x192x256xbf16, #tpu.memory_space<vmem>>, vector<1x192x256xbf16>
    %40 = vector.shape_cast %39 : vector<1x192x256xbf16> to vector<192x256xbf16>
    %cst_38 = arith.constant dense<0.000000e+00> : vector<16x256xf32>
    %41 = tpu.matmul %15, %40, %cst_38 {dimension_numbers = #tpu.dot_dimension_numbers<[1], [0], [0], [1], [0, 0, 1, 1], [], []>} : vector<16x192xbf16>, vector<192x256xbf16>, vector<16x256xf32> -> vector<16x256xf32>
    %42 = arith.addf %38, %41 : vector<16x256xf32>
    %c4 = arith.constant 4 : index
    %c0_39 = arith.constant 0 : index
    %c0_40 = arith.constant 0 : index
    %43 = vector.load %arg2[%c4, %c0_39, %c0_40] : memref<5x192x256xbf16, #tpu.memory_space<vmem>>, vector<1x192x256xbf16>
    %44 = vector.shape_cast %43 : vector<1x192x256xbf16> to vector<192x256xbf16>
    %cst_41 = arith.constant dense<0.000000e+00> : vector<16x256xf32>
    %45 = tpu.matmul %19, %44, %cst_41 {dimension_numbers = #tpu.dot_dimension_numbers<[1], [0], [0], [1], [0, 0, 1, 1], [], []>} : vector<16x192xbf16>, vector<192x256xbf16>, vector<16x256xf32> -> vector<16x256xf32>
    %46 = arith.addf %42, %45 : vector<16x256xf32>
    %c0_42 = arith.constant 0 : index
    %c0_43 = arith.constant 0 : index
    %c0_44 = arith.constant 0 : index
    %47 = vector.load %arg2[%c0_42, %c0_43, %c0_44] : memref<5x192x256xbf16, #tpu.memory_space<vmem>>, vector<1x192x256xbf16>
    %48 = vector.shape_cast %47 : vector<1x192x256xbf16> to vector<192x256xbf16>
    %cst_45 = arith.constant dense<0.000000e+00> : vector<16x256xf32>
    %49 = tpu.matmul %11, %48, %cst_45 {dimension_numbers = #tpu.dot_dimension_numbers<[1], [0], [0], [1], [0, 0, 1, 1], [], []>} : vector<16x192xbf16>, vector<192x256xbf16>, vector<16x256xf32> -> vector<16x256xf32>
    %c1_46 = arith.constant 1 : index
    %c0_47 = arith.constant 0 : index
    %c0_48 = arith.constant 0 : index
    %50 = vector.load %arg2[%c1_46, %c0_47, %c0_48] : memref<5x192x256xbf16, #tpu.memory_space<vmem>>, vector<1x192x256xbf16>
    %51 = vector.shape_cast %50 : vector<1x192x256xbf16> to vector<192x256xbf16>
    %cst_49 = arith.constant dense<0.000000e+00> : vector<16x256xf32>
    %52 = tpu.matmul %15, %51, %cst_49 {dimension_numbers = #tpu.dot_dimension_numbers<[1], [0], [0], [1], [0, 0, 1, 1], [], []>} : vector<16x192xbf16>, vector<192x256xbf16>, vector<16x256xf32> -> vector<16x256xf32>
    %53 = arith.addf %49, %52 : vector<16x256xf32>
    %c2_50 = arith.constant 2 : index
    %c0_51 = arith.constant 0 : index
    %c0_52 = arith.constant 0 : index
    %54 = vector.load %arg2[%c2_50, %c0_51, %c0_52] : memref<5x192x256xbf16, #tpu.memory_space<vmem>>, vector<1x192x256xbf16>
    %55 = vector.shape_cast %54 : vector<1x192x256xbf16> to vector<192x256xbf16>
    %cst_53 = arith.constant dense<0.000000e+00> : vector<16x256xf32>
    %56 = tpu.matmul %19, %55, %cst_53 {dimension_numbers = #tpu.dot_dimension_numbers<[1], [0], [0], [1], [0, 0, 1, 1], [], []>} : vector<16x192xbf16>, vector<192x256xbf16>, vector<16x256xf32> -> vector<16x256xf32>
    %57 = arith.addf %53, %56 : vector<16x256xf32>
    %c3_54 = arith.constant 3 : index
    %c0_55 = arith.constant 0 : index
    %c0_56 = arith.constant 0 : index
    %58 = vector.load %arg2[%c3_54, %c0_55, %c0_56] : memref<5x192x256xbf16, #tpu.memory_space<vmem>>, vector<1x192x256xbf16>
    %59 = vector.shape_cast %58 : vector<1x192x256xbf16> to vector<192x256xbf16>
    %cst_57 = arith.constant dense<0.000000e+00> : vector<16x256xf32>
    %60 = tpu.matmul %23, %59, %cst_57 {dimension_numbers = #tpu.dot_dimension_numbers<[1], [0], [0], [1], [0, 0, 1, 1], [], []>} : vector<16x192xbf16>, vector<192x256xbf16>, vector<16x256xf32> -> vector<16x256xf32>
    %61 = arith.addf %57, %60 : vector<16x256xf32>
    %c4_58 = arith.constant 4 : index
    %c0_59 = arith.constant 0 : index
    %c0_60 = arith.constant 0 : index
    %62 = vector.load %arg2[%c4_58, %c0_59, %c0_60] : memref<5x192x256xbf16, #tpu.memory_space<vmem>>, vector<1x192x256xbf16>
    %63 = vector.shape_cast %62 : vector<1x192x256xbf16> to vector<192x256xbf16>
    %cst_61 = arith.constant dense<0.000000e+00> : vector<16x256xf32>
    %64 = tpu.matmul %27, %63, %cst_61 {dimension_numbers = #tpu.dot_dimension_numbers<[1], [0], [0], [1], [0, 0, 1, 1], [], []>} : vector<16x192xbf16>, vector<192x256xbf16>, vector<16x256xf32> -> vector<16x256xf32>
    %65 = arith.addf %61, %64 : vector<16x256xf32>
    %c0_62 = arith.constant 0 : index
    %c0_63 = arith.constant 0 : index
    %66 = vector.load %arg6[%c0_62, %c0_63] : memref<1x256xf32, #tpu.memory_space<vmem>>, vector<1x256xf32>
    %67 = vector.broadcast %66 : vector<1x256xf32> to vector<16x256xf32>
    %68 = arith.addf %46, %67 : vector<16x256xf32>
    %cst_64 = arith.constant 0.000000e+00 : f32
    %69 = vector.broadcast %cst_64 : f32 to vector<16x256xf32>
    %70 = arith.maximumf %68, %69 : vector<16x256xf32>
    %71 = vector.shape_cast %70 : vector<16x256xf32> to vector<2x8x256xf32>
    %72 = vector.broadcast %66 : vector<1x256xf32> to vector<16x256xf32>
    %73 = arith.addf %65, %72 : vector<16x256xf32>
    %cst_65 = arith.constant 0.000000e+00 : f32
    %74 = vector.broadcast %cst_65 : f32 to vector<16x256xf32>
    %75 = arith.maximumf %73, %74 : vector<16x256xf32>
    %76 = vector.shape_cast %75 : vector<16x256xf32> to vector<2x8x256xf32>
    %cst_66 = arith.constant 0.000000e+00 : f32
    %77 = vector.broadcast %cst_66 : f32 to vector<2x2x1x256xf32>
    %c0_67 = arith.constant 0 : index
    %c0_68 = arith.constant 0 : index
    %c0_69 = arith.constant 0 : index
    %c0_70 = arith.constant 0 : index
    %78 = vector.load %arg11[%c0_67, %c0_68, %c0_69, %c0_70] : memref<2x2x10x256xf32, #tpu.memory_space<vmem>>, vector<2x2x1x256xf32>
    tpu.vector_store %arg11[%c0_67, %c0_68, %c0_69, %c0_70], %77 {strides = array<i32>} : memref<2x2x10x256xf32, #tpu.memory_space<vmem>>, vector<2x2x1x256xf32>,
    %c0_71 = arith.constant 0 : index
    %c0_72 = arith.constant 0 : index
    %c9 = arith.constant 9 : index
    %c0_73 = arith.constant 0 : index
    %79 = vector.load %arg11[%c0_71, %c0_72, %c9, %c0_73] : memref<2x2x10x256xf32, #tpu.memory_space<vmem>>, vector<2x2x1x256xf32>
    tpu.vector_store %arg11[%c0_71, %c0_72, %c9, %c0_73], %77 {strides = array<i32>} : memref<2x2x10x256xf32, #tpu.memory_space<vmem>>, vector<2x2x1x256xf32>,
    %c0_74 = arith.constant 0 : index
    %c0_75 = arith.constant 0 : index
    %c1_76 = arith.constant 1 : index
    %c0_77 = arith.constant 0 : index
    %80 = vector.load %arg11[%c0_74, %c0_75, %c1_76, %c0_77] : memref<2x2x10x256xf32, #tpu.memory_space<vmem>>, vector<2x1x8x256xf32>
    %81 = vector.shape_cast %80 : vector<2x1x8x256xf32> to vector<2x8x256xf32>
    %82 = vector.shape_cast %71 : vector<2x8x256xf32> to vector<2x1x8x256xf32>
    tpu.vector_store %arg11[%c0_74, %c0_75, %c1_76, %c0_77], %82 {strides = array<i32>} : memref<2x2x10x256xf32, #tpu.memory_space<vmem>>, vector<2x1x8x256xf32>,
    %c0_78 = arith.constant 0 : index
    %c1_79 = arith.constant 1 : index
    %c1_80 = arith.constant 1 : index
    %c0_81 = arith.constant 0 : index
    %83 = vector.load %arg11[%c0_78, %c1_79, %c1_80, %c0_81] : memref<2x2x10x256xf32, #tpu.memory_space<vmem>>, vector<2x1x8x256xf32>
    %84 = vector.shape_cast %83 : vector<2x1x8x256xf32> to vector<2x8x256xf32>
    %85 = vector.shape_cast %76 : vector<2x8x256xf32> to vector<2x1x8x256xf32>
    tpu.vector_store %arg11[%c0_78, %c1_79, %c1_80, %c0_81], %85 {strides = array<i32>} : memref<2x2x10x256xf32, #tpu.memory_space<vmem>>, vector<2x1x8x256xf32>,
    %c0_82 = arith.constant 0 : index
    %c0_83 = arith.constant 0 : index
    %c0_84 = arith.constant 0 : index
    %c0_85 = arith.constant 0 : index
    %86 = vector.load %arg11[%c0_82, %c0_83, %c0_84, %c0_85] : memref<2x2x10x256xf32, #tpu.memory_space<vmem>>, vector<2x1x8x256xf32>
    %87 = vector.shape_cast %86 : vector<2x1x8x256xf32> to vector<2x8x256xf32>
    %88 = vector.shape_cast %87 : vector<2x8x256xf32> to vector<16x256xf32>
    %89 = arith.truncf %88 : vector<16x256xf32> to vector<16x256xbf16>
    %c0_86 = arith.constant 0 : index
    %c0_87 = arith.constant 0 : index
    %c0_88 = arith.constant 0 : index
    %90 = vector.load %arg3[%c0_86, %c0_87, %c0_88] : memref<5x256x128xbf16, #tpu.memory_space<vmem>>, vector<1x256x128xbf16>
    %91 = vector.shape_cast %90 : vector<1x256x128xbf16> to vector<256x128xbf16>
    %cst_89 = arith.constant dense<0.000000e+00> : vector<16x128xf32>
    %92 = tpu.matmul %89, %91, %cst_89 {dimension_numbers = #tpu.dot_dimension_numbers<[1], [0], [0], [1], [0, 0, 1, 1], [], []>} : vector<16x256xbf16>, vector<256x128xbf16>, vector<16x128xf32> -> vector<16x128xf32>
    %c0_90 = arith.constant 0 : index
    %c1_91 = arith.constant 1 : index
    %c0_92 = arith.constant 0 : index
    %c0_93 = arith.constant 0 : index
    %93 = vector.load %arg11[%c0_90, %c1_91, %c0_92, %c0_93] : memref<2x2x10x256xf32, #tpu.memory_space<vmem>>, vector<2x1x8x256xf32>
    %94 = vector.shape_cast %93 : vector<2x1x8x256xf32> to vector<2x8x256xf32>
    %95 = vector.shape_cast %94 : vector<2x8x256xf32> to vector<16x256xf32>
    %96 = arith.truncf %95 : vector<16x256xf32> to vector<16x256xbf16>
    %c1_94 = arith.constant 1 : index
    %c0_95 = arith.constant 0 : index
    %c0_96 = arith.constant 0 : index
    %97 = vector.load %arg3[%c1_94, %c0_95, %c0_96] : memref<5x256x128xbf16, #tpu.memory_space<vmem>>, vector<1x256x128xbf16>
    %98 = vector.shape_cast %97 : vector<1x256x128xbf16> to vector<256x128xbf16>
    %cst_97 = arith.constant dense<0.000000e+00> : vector<16x128xf32>
    %99 = tpu.matmul %96, %98, %cst_97 {dimension_numbers = #tpu.dot_dimension_numbers<[1], [0], [0], [1], [0, 0, 1, 1], [], []>} : vector<16x256xbf16>, vector<256x128xbf16>, vector<16x128xf32> -> vector<16x128xf32>
    %100 = arith.addf %92, %99 : vector<16x128xf32>
    %c0_98 = arith.constant 0 : index
    %c0_99 = arith.constant 0 : index
    %c1_100 = arith.constant 1 : index
    %c0_101 = arith.constant 0 : index
    %101 = vector.load %arg11[%c0_98, %c0_99, %c1_100, %c0_101] : memref<2x2x10x256xf32, #tpu.memory_space<vmem>>, vector<2x1x8x256xf32>
    %102 = vector.shape_cast %101 : vector<2x1x8x256xf32> to vector<2x8x256xf32>
    %103 = vector.shape_cast %102 : vector<2x8x256xf32> to vector<16x256xf32>
    %104 = arith.truncf %103 : vector<16x256xf32> to vector<16x256xbf16>
    %c2_102 = arith.constant 2 : index
    %c0_103 = arith.constant 0 : index
    %c0_104 = arith.constant 0 : index
    %105 = vector.load %arg3[%c2_102, %c0_103, %c0_104] : memref<5x256x128xbf16, #tpu.memory_space<vmem>>, vector<1x256x128xbf16>
    %106 = vector.shape_cast %105 : vector<1x256x128xbf16> to vector<256x128xbf16>
    %cst_105 = arith.constant dense<0.000000e+00> : vector<16x128xf32>
    %107 = tpu.matmul %104, %106, %cst_105 {dimension_numbers = #tpu.dot_dimension_numbers<[1], [0], [0], [1], [0, 0, 1, 1], [], []>} : vector<16x256xbf16>, vector<256x128xbf16>, vector<16x128xf32> -> vector<16x128xf32>
    %108 = arith.addf %100, %107 : vector<16x128xf32>
    %c0_106 = arith.constant 0 : index
    %c1_107 = arith.constant 1 : index
    %c1_108 = arith.constant 1 : index
    %c0_109 = arith.constant 0 : index
    %109 = vector.load %arg11[%c0_106, %c1_107, %c1_108, %c0_109] : memref<2x2x10x256xf32, #tpu.memory_space<vmem>>, vector<2x1x8x256xf32>
    %110 = vector.shape_cast %109 : vector<2x1x8x256xf32> to vector<2x8x256xf32>
    %111 = vector.shape_cast %110 : vector<2x8x256xf32> to vector<16x256xf32>
    %112 = arith.truncf %111 : vector<16x256xf32> to vector<16x256xbf16>
    %c3_110 = arith.constant 3 : index
    %c0_111 = arith.constant 0 : index
    %c0_112 = arith.constant 0 : index
    %113 = vector.load %arg3[%c3_110, %c0_111, %c0_112] : memref<5x256x128xbf16, #tpu.memory_space<vmem>>, vector<1x256x128xbf16>
    %114 = vector.shape_cast %113 : vector<1x256x128xbf16> to vector<256x128xbf16>
    %cst_113 = arith.constant dense<0.000000e+00> : vector<16x128xf32>
    %115 = tpu.matmul %112, %114, %cst_113 {dimension_numbers = #tpu.dot_dimension_numbers<[1], [0], [0], [1], [0, 0, 1, 1], [], []>} : vector<16x256xbf16>, vector<256x128xbf16>, vector<16x128xf32> -> vector<16x128xf32>
    %116 = arith.addf %108, %115 : vector<16x128xf32>
    %c0_114 = arith.constant 0 : index
    %c0_115 = arith.constant 0 : index
    %c2_116 = arith.constant 2 : index
    %c0_117 = arith.constant 0 : index
    %117 = vector.load %arg11[%c0_114, %c0_115, %c2_116, %c0_117] : memref<2x2x10x256xf32, #tpu.memory_space<vmem>>, vector<2x1x8x256xf32>
    %118 = vector.shape_cast %117 : vector<2x1x8x256xf32> to vector<2x8x256xf32>
    %119 = vector.shape_cast %118 : vector<2x8x256xf32> to vector<16x256xf32>
    %120 = arith.truncf %119 : vector<16x256xf32> to vector<16x256xbf16>
    %c4_118 = arith.constant 4 : index
    %c0_119 = arith.constant 0 : index
    %c0_120 = arith.constant 0 : index
    %121 = vector.load %arg3[%c4_118, %c0_119, %c0_120] : memref<5x256x128xbf16, #tpu.memory_space<vmem>>, vector<1x256x128xbf16>
    %122 = vector.shape_cast %121 : vector<1x256x128xbf16> to vector<256x128xbf16>
    %cst_121 = arith.constant dense<0.000000e+00> : vector<16x128xf32>
    %123 = tpu.matmul %120, %122, %cst_121 {dimension_numbers = #tpu.dot_dimension_numbers<[1], [0], [0], [1], [0, 0, 1, 1], [], []>} : vector<16x256xbf16>, vector<256x128xbf16>, vector<16x128xf32> -> vector<16x128xf32>
    %124 = arith.addf %116, %123 : vector<16x128xf32>
    %c0_122 = arith.constant 0 : index
    %c0_123 = arith.constant 0 : index
    %125 = vector.load %arg7[%c0_122, %c0_123] : memref<1x128xf32, #tpu.memory_space<vmem>>, vector<1x128xf32>
    %126 = vector.broadcast %125 : vector<1x128xf32> to vector<16x128xf32>
    %127 = arith.addf %124, %126 : vector<16x128xf32>
    %cst_124 = arith.constant 0.000000e+00 : f32
    %128 = vector.broadcast %cst_124 : f32 to vector<16x128xf32>
    %129 = arith.maximumf %127, %128 : vector<16x128xf32>
    %130 = arith.truncf %129 : vector<16x128xf32> to vector<16x128xbf16>
    %131 = vector.shape_cast %130 : vector<16x128xbf16> to vector<2x8x128xbf16>
    %132 = vector.extract_strided_slice %131 {offsets = [0, 0, 0], sizes = [2, 1, 128], strides = [1, 1, 1]} : vector<2x8x128xbf16> to vector<2x1x128xbf16>
    %133 = vector.shape_cast %132 : vector<2x1x128xbf16> to vector<2x128xbf16>
    %c0_125 = arith.constant 0 : index
    %c0_126 = arith.constant 0 : index
    %c0_127 = arith.constant 0 : index
    %134 = vector.load %arg4[%c0_125, %c0_126, %c0_127] : memref<8x128x128xbf16, #tpu.memory_space<vmem>>, vector<1x128x128xbf16>
    %135 = vector.shape_cast %134 : vector<1x128x128xbf16> to vector<128x128xbf16>
    %cst_128 = arith.constant dense<0.000000e+00> : vector<2x128xf32>
    %136 = tpu.matmul %133, %135, %cst_128 {dimension_numbers = #tpu.dot_dimension_numbers<[1], [0], [0], [1], [0, 0, 1, 1], [], []>} : vector<2x128xbf16>, vector<128x128xbf16>, vector<2x128xf32> -> vector<2x128xf32>
    %137 = vector.extract_strided_slice %131 {offsets = [0, 1, 0], sizes = [2, 1, 128], strides = [1, 1, 1]} : vector<2x8x128xbf16> to vector<2x1x128xbf16>
    %138 = vector.shape_cast %137 : vector<2x1x128xbf16> to vector<2x128xbf16>
    %c1_129 = arith.constant 1 : index
    %c0_130 = arith.constant 0 : index
    %c0_131 = arith.constant 0 : index
    %139 = vector.load %arg4[%c1_129, %c0_130, %c0_131] : memref<8x128x128xbf16, #tpu.memory_space<vmem>>, vector<1x128x128xbf16>
    %140 = vector.shape_cast %139 : vector<1x128x128xbf16> to vector<128x128xbf16>
    %cst_132 = arith.constant dense<0.000000e+00> : vector<2x128xf32>
    %141 = tpu.matmul %138, %140, %cst_132 {dimension_numbers = #tpu.dot_dimension_numbers<[1], [0], [0], [1], [0, 0, 1, 1], [], []>} : vector<2x128xbf16>, vector<128x128xbf16>, vector<2x128xf32> -> vector<2x128xf32>
    %142 = arith.addf %136, %141 : vector<2x128xf32>
    %143 = vector.extract_strided_slice %131 {offsets = [0, 2, 0], sizes = [2, 1, 128], strides = [1, 1, 1]} : vector<2x8x128xbf16> to vector<2x1x128xbf16>
    %144 = vector.shape_cast %143 : vector<2x1x128xbf16> to vector<2x128xbf16>
    %c2_133 = arith.constant 2 : index
    %c0_134 = arith.constant 0 : index
    %c0_135 = arith.constant 0 : index
    %145 = vector.load %arg4[%c2_133, %c0_134, %c0_135] : memref<8x128x128xbf16, #tpu.memory_space<vmem>>, vector<1x128x128xbf16>
    %146 = vector.shape_cast %145 : vector<1x128x128xbf16> to vector<128x128xbf16>
    %cst_136 = arith.constant dense<0.000000e+00> : vector<2x128xf32>
    %147 = tpu.matmul %144, %146, %cst_136 {dimension_numbers = #tpu.dot_dimension_numbers<[1], [0], [0], [1], [0, 0, 1, 1], [], []>} : vector<2x128xbf16>, vector<128x128xbf16>, vector<2x128xf32> -> vector<2x128xf32>
    %148 = arith.addf %142, %147 : vector<2x128xf32>
    %149 = vector.extract_strided_slice %131 {offsets = [0, 3, 0], sizes = [2, 1, 128], strides = [1, 1, 1]} : vector<2x8x128xbf16> to vector<2x1x128xbf16>
    %150 = vector.shape_cast %149 : vector<2x1x128xbf16> to vector<2x128xbf16>
    %c3_137 = arith.constant 3 : index
    %c0_138 = arith.constant 0 : index
    %c0_139 = arith.constant 0 : index
    %151 = vector.load %arg4[%c3_137, %c0_138, %c0_139] : memref<8x128x128xbf16, #tpu.memory_space<vmem>>, vector<1x128x128xbf16>
    %152 = vector.shape_cast %151 : vector<1x128x128xbf16> to vector<128x128xbf16>
    %cst_140 = arith.constant dense<0.000000e+00> : vector<2x128xf32>
    %153 = tpu.matmul %150, %152, %cst_140 {dimension_numbers = #tpu.dot_dimension_numbers<[1], [0], [0], [1], [0, 0, 1, 1], [], []>} : vector<2x128xbf16>, vector<128x128xbf16>, vector<2x128xf32> -> vector<2x128xf32>
    %154 = arith.addf %148, %153 : vector<2x128xf32>
    %155 = vector.extract_strided_slice %131 {offsets = [0, 4, 0], sizes = [2, 1, 128], strides = [1, 1, 1]} : vector<2x8x128xbf16> to vector<2x1x128xbf16>
    %156 = vector.shape_cast %155 : vector<2x1x128xbf16> to vector<2x128xbf16>
    %c4_141 = arith.constant 4 : index
    %c0_142 = arith.constant 0 : index
    %c0_143 = arith.constant 0 : index
    %157 = vector.load %arg4[%c4_141, %c0_142, %c0_143] : memref<8x128x128xbf16, #tpu.memory_space<vmem>>, vector<1x128x128xbf16>
    %158 = vector.shape_cast %157 : vector<1x128x128xbf16> to vector<128x128xbf16>
    %cst_144 = arith.constant dense<0.000000e+00> : vector<2x128xf32>
    %159 = tpu.matmul %156, %158, %cst_144 {dimension_numbers = #tpu.dot_dimension_numbers<[1], [0], [0], [1], [0, 0, 1, 1], [], []>} : vector<2x128xbf16>, vector<128x128xbf16>, vector<2x128xf32> -> vector<2x128xf32>
    %160 = arith.addf %154, %159 : vector<2x128xf32>
    %161 = vector.extract_strided_slice %131 {offsets = [0, 5, 0], sizes = [2, 1, 128], strides = [1, 1, 1]} : vector<2x8x128xbf16> to vector<2x1x128xbf16>
    %162 = vector.shape_cast %161 : vector<2x1x128xbf16> to vector<2x128xbf16>
    %c5 = arith.constant 5 : index
    %c0_145 = arith.constant 0 : index
    %c0_146 = arith.constant 0 : index
    %163 = vector.load %arg4[%c5, %c0_145, %c0_146] : memref<8x128x128xbf16, #tpu.memory_space<vmem>>, vector<1x128x128xbf16>
    %164 = vector.shape_cast %163 : vector<1x128x128xbf16> to vector<128x128xbf16>
    %cst_147 = arith.constant dense<0.000000e+00> : vector<2x128xf32>
    %165 = tpu.matmul %162, %164, %cst_147 {dimension_numbers = #tpu.dot_dimension_numbers<[1], [0], [0], [1], [0, 0, 1, 1], [], []>} : vector<2x128xbf16>, vector<128x128xbf16>, vector<2x128xf32> -> vector<2x128xf32>
    %166 = arith.addf %160, %165 : vector<2x128xf32>
    %167 = vector.extract_strided_slice %131 {offsets = [0, 6, 0], sizes = [2, 1, 128], strides = [1, 1, 1]} : vector<2x8x128xbf16> to vector<2x1x128xbf16>
    %168 = vector.shape_cast %167 : vector<2x1x128xbf16> to vector<2x128xbf16>
    %c6 = arith.constant 6 : index
    %c0_148 = arith.constant 0 : index
    %c0_149 = arith.constant 0 : index
    %169 = vector.load %arg4[%c6, %c0_148, %c0_149] : memref<8x128x128xbf16, #tpu.memory_space<vmem>>, vector<1x128x128xbf16>
    %170 = vector.shape_cast %169 : vector<1x128x128xbf16> to vector<128x128xbf16>
    %cst_150 = arith.constant dense<0.000000e+00> : vector<2x128xf32>
    %171 = tpu.matmul %168, %170, %cst_150 {dimension_numbers = #tpu.dot_dimension_numbers<[1], [0], [0], [1], [0, 0, 1, 1], [], []>} : vector<2x128xbf16>, vector<128x128xbf16>, vector<2x128xf32> -> vector<2x128xf32>
    %172 = arith.addf %166, %171 : vector<2x128xf32>
    %173 = vector.extract_strided_slice %131 {offsets = [0, 7, 0], sizes = [2, 1, 128], strides = [1, 1, 1]} : vector<2x8x128xbf16> to vector<2x1x128xbf16>
    %174 = vector.shape_cast %173 : vector<2x1x128xbf16> to vector<2x128xbf16>
    %c7 = arith.constant 7 : index
    %c0_151 = arith.constant 0 : index
    %c0_152 = arith.constant 0 : index
    %175 = vector.load %arg4[%c7, %c0_151, %c0_152] : memref<8x128x128xbf16, #tpu.memory_space<vmem>>, vector<1x128x128xbf16>
    %176 = vector.shape_cast %175 : vector<1x128x128xbf16> to vector<128x128xbf16>
    %cst_153 = arith.constant dense<0.000000e+00> : vector<2x128xf32>
    %177 = tpu.matmul %174, %176, %cst_153 {dimension_numbers = #tpu.dot_dimension_numbers<[1], [0], [0], [1], [0, 0, 1, 1], [], []>} : vector<2x128xbf16>, vector<128x128xbf16>, vector<2x128xf32> -> vector<2x128xf32>
    %178 = arith.addf %172, %177 : vector<2x128xf32>
    %c0_154 = arith.constant 0 : index
    %c0_155 = arith.constant 0 : index
    %179 = vector.load %arg8[%c0_154, %c0_155] : memref<1x128xf32, #tpu.memory_space<vmem>>, vector<1x128xf32>
    %180 = vector.broadcast %179 : vector<1x128xf32> to vector<2x128xf32>
    %181 = arith.addf %178, %180 : vector<2x128xf32>
    %cst_156 = arith.constant 0.000000e+00 : f32
    %182 = vector.broadcast %cst_156 : f32 to vector<2x128xf32>
    %183 = arith.maximumf %181, %182 : vector<2x128xf32>
    %184 = arith.truncf %183 : vector<2x128xf32> to vector<2x128xbf16>
    %c0_157 = arith.constant 0 : index
    %c0_158 = arith.constant 0 : index
    %185 = vector.load %arg5[%c0_157, %c0_158] : memref<128x128xbf16, #tpu.memory_space<vmem>>, vector<128x128xbf16>
    %cst_159 = arith.constant dense<0.000000e+00> : vector<2x128xf32>
    %186 = tpu.matmul %184, %185, %cst_159 {dimension_numbers = #tpu.dot_dimension_numbers<[1], [0], [0], [1], [0, 0, 1, 1], [], []>} : vector<2x128xbf16>, vector<128x128xbf16>, vector<2x128xf32> -> vector<2x128xf32>
    %c0_160 = arith.constant 0 : index
    %c0_161 = arith.constant 0 : index
    %187 = vector.load %arg9[%c0_160, %c0_161] : memref<1x128xf32, #tpu.memory_space<vmem>>, vector<1x128xf32>
    %188 = vector.broadcast %187 : vector<1x128xf32> to vector<2x128xf32>
    %189 = arith.addf %186, %188 : vector<2x128xf32>
    %190 = math.tanh %189 : vector<2x128xf32>
    %cst_162 = arith.constant 2.000000e+00 : f32
    %191 = vector.broadcast %cst_162 : f32 to vector<2x128xf32>
    %192 = arith.mulf %191, %190 : vector<2x128xf32>
    %c0_163 = arith.constant 0 : index
    %c0_164 = arith.constant 0 : index
    %193 = vector.load %arg10[%c0_163, %c0_164] : memref<2x128xf32, #tpu.memory_space<vmem>>, vector<2x128xf32>
    tpu.vector_store %arg10[%c0_163, %c0_164], %192 {strides = array<i32>} : memref<2x128xf32, #tpu.memory_space<vmem>>, vector<2x128xf32>,
    return
  }
  func.func @transform_0(%arg0: i32) -> (i32, i32, i32, i32) {
    %c0_i32 = arith.constant 0 : i32
    %c0_i32_0 = arith.constant 0 : i32
    %c0_i32_1 = arith.constant 0 : i32
    %c0_i32_2 = arith.constant 0 : i32
    return %arg0, %c0_i32, %c0_i32_0, %c0_i32_1 : i32, i32, i32, i32
  }
  func.func @transform_1(%arg0: i32) -> (i32, i32, i32) {
    %c0_i32 = arith.constant 0 : i32
    %c0_i32_0 = arith.constant 0 : i32
    %c0_i32_1 = arith.constant 0 : i32
    %c0_i32_2 = arith.constant 0 : i32
    return %c0_i32, %c0_i32_0, %c0_i32_1 : i32, i32, i32
  }
  func.func @transform_2(%arg0: i32) -> (i32, i32, i32) {
    %c0_i32 = arith.constant 0 : i32
    %c0_i32_0 = arith.constant 0 : i32
    %c0_i32_1 = arith.constant 0 : i32
    %c0_i32_2 = arith.constant 0 : i32
    return %c0_i32, %c0_i32_0, %c0_i32_1 : i32, i32, i32
  }
  func.func @transform_3(%arg0: i32) -> (i32, i32, i32) {
    %c0_i32 = arith.constant 0 : i32
    %c0_i32_0 = arith.constant 0 : i32
    %c0_i32_1 = arith.constant 0 : i32
    %c0_i32_2 = arith.constant 0 : i32
    return %c0_i32, %c0_i32_0, %c0_i32_1 : i32, i32, i32
  }
  func.func @transform_4(%arg0: i32) -> (i32, i32) {
    %c0_i32 = arith.constant 0 : i32
    %c0_i32_0 = arith.constant 0 : i32
    %c0_i32_1 = arith.constant 0 : i32
    return %c0_i32, %c0_i32_0 : i32, i32
  }
  func.func @transform_5(%arg0: i32) -> (i32, i32) {
    %c0_i32 = arith.constant 0 : i32
    %c0_i32_0 = arith.constant 0 : i32
    %c0_i32_1 = arith.constant 0 : i32
    return %c0_i32, %c0_i32_0 : i32, i32
  }
  func.func @transform_6(%arg0: i32) -> (i32, i32) {
    %c0_i32 = arith.constant 0 : i32
    %c0_i32_0 = arith.constant 0 : i32
    %c0_i32_1 = arith.constant 0 : i32
    return %c0_i32, %c0_i32_0 : i32, i32
  }
  func.func @transform_7(%arg0: i32) -> (i32, i32) {
    %c0_i32 = arith.constant 0 : i32
    %c0_i32_0 = arith.constant 0 : i32
    %c0_i32_1 = arith.constant 0 : i32
    return %c0_i32, %c0_i32_0 : i32, i32
  }
  func.func @transform_8(%arg0: i32) -> (i32, i32) {
    %c0_i32 = arith.constant 0 : i32
    %c0_i32_0 = arith.constant 0 : i32
    %c0_i32_1 = arith.constant 0 : i32
    return %c0_i32, %c0_i32_0 : i32, i32
  }
  func.func @transform_9(%arg0: i32) -> (i32, i32) {
    %c0_i32 = arith.constant 0 : i32
    %c0_i32_0 = arith.constant 0 : i32
    return %arg0, %c0_i32 : i32, i32
  }
}

</mosaic_0001>

<bundles_post_ra>
// kernel: actor_forward.1
= control target key start
LH: loop header
LB: loop body
LE: loop exit
PB: predicated region body
PF: predicated region fallthrough
CT: control target
= control target key end

     0   :  { %14 = vsyncpa [#allocation4], 0  ;;  %s5976_s0 = inlined_call_operand.vmem [shape: f32[2,4,9,192], index: 0, kind: input, shape index: {}]   ;;  %s5977_s1 = inlined_call_operand.vmem [shape: bf16[5,192,256], index: 1, kind: input, shape index: {}]   ;;  %s5978_s2 = inlined_call_operand.hbm [shape: bf16[5,256,128], index: 2, kind: input, shape index: {}]   ;;  %s5979_s3 = inlined_call_operand.hbm [shape: bf16[8,128,128], index: 3, kind: input, shape index: {}]   ;;  %s5980_s4 = inlined_call_operand.vmem [shape: bf16[128,128], index: 4, kind: input, shape index: {}]   ;;  %s5981_s5 = inlined_call_operand.vmem [shape: f32[1,256], index: 5, kind: input, shape index: {}]   ;;  %s5982_s6 = inlined_call_operand.vmem [shape: f32[1,128], index: 6, kind: input, shape index: {}]   ;;  %s5983_s7 = inlined_call_operand.vmem [shape: f32[1,128], index: 7, kind: input, shape index: {}]   ;;  %s5984_s8 = inlined_call_operand.vmem [shape: f32[1,128], index: 8, kind: input, shape index: {}]   ;;  %s5985_s9 = inlined_call_operand.hbm [shape: f32[2,128], index: 9, kind: output, shape index: {}]  }
   0x1   :  { %15 = vsyncpa [#allocation7], 0 }
   0x2   :  { %16 = vsyncpa [#allocation5], 0  ;;  %s4740_s30 = smov [#allocation3]  }
   0x3   :  { %s26_s10 = sshll.u32 %s4740_s30, 4  ;;  %s27_s10 = int_to_ptr.vmem [resolvable:$true] %s26_s10 }
   0x4   :  { %s4682_s11 = scalar_lea.vmem %s27_s10, 10240  ;;  %p4687_p1 = scmp.lt.s32.totalorder %s27_s10, %s27_s10 }
   0x5   :  { %p4683_p0 = scmp.ne.s32.totalorder %s27_s10, %s4682_s11  ;;  %p4688_p2 = scmp.lt.s32.totalorder %s4682_s11, %s4682_s11 }
   0x7   :  { %p4689_p3 = por %p4688_p2, %p4687_p1 }
   0x9   :  { %p4690_p4 = pnand %p4689_p3, %p4683_p0 }
   0xb   :  { %4693 = shalt.err (!%p4690_p4)
}
   0xc   :  { %s4741_s12 = smov 64   ;;  %s4742_s13 = smov 4  }
   0xd   :  { %32 = dma.hbm_to_vmem [thread:$0]  %s5978_s2, 10240, %s27_s10, [#allocation4], %s4741_s12, %s4741_s12, %s4742_s13  }
   0xe   :  { %s4743_s16 = smov [#allocation6]  }
   0xf   :  { %s38_s17 = sshll.u32 %s4743_s16, 4  ;;  %s39_s17 = int_to_ptr.vmem [resolvable:$true] %s38_s17 }
  0x10   :  { %s4702_s18 = scalar_lea.vmem %s39_s17, 8192  ;;  %p4707_p6 = scmp.lt.s32.totalorder %s39_s17, %s39_s17 }
  0x11   :  { %p4703_p5 = scmp.ne.s32.totalorder %s39_s17, %s4702_s18  ;;  %p4708_p7 = scmp.lt.s32.totalorder %s4702_s18, %s4702_s18 }
  0x13   :  { %p4709_p8 = por %p4708_p7, %p4707_p6 }
  0x15   :  { %p4710_p9 = pnand %p4709_p8, %p4703_p5 }
  0x17   :  { %4713 = shalt.err (!%p4710_p9)
}
  0x18   :  { %44 = dma.hbm_to_vmem [thread:$0]  %s5979_s3, 8192, %s39_s17, [#allocation7], %s4741_s12, %s4741_s12, %s4742_s13  }
  0x19   :  { %4734 = dma.done.wait [#allocation4], 10240  }
  0x1a   :  { %4735 = vsyncadd [#allocation4], 4294957056 }
  0x1b   :  { %4736 = dma.done.wait [#allocation7], 8192  }
  0x1c   :  { %4737 = vsyncadd [#allocation7], 4294959104  ;;  %v4806_v0 = vld [vmem:[%s5977_s1 + $0x134] ss:$8 sps:$4 sm:$0xff]   ;;  %v4815_v2 = vld [vmem:[%s5977_s1 + $0x130] ss:$8 sps:$4 sm:$0xff]  }
  0x1d   :  { %v4294_v1 = vld [vmem:[%s5977_s1 + $0x74] ss:$8 sps:$4 sm:$0xff]   ;;  %365 = vmatprep.subr.bf16.mxu0 %v4806_v0  ;;  %v4297_v3 = vld [vmem:[%s5977_s1 + $0x70] ss:$8 sps:$4 sm:$0xff]   ;;  %v4823_v4 = vld [vmem:[%s5977_s1 + $0x124] ss:$8 sps:$4 sm:$0xff]  }
  0x1e   :  { %531 = vmatprep.subr.bf16.mxu1 %v4294_v1  ;;  %366 = vmatpush1.bf16.msra.mxu0 %v4815_v2  ;;  %v4300_v5 = vld [vmem:[%s5977_s1 + $0x64] ss:$8 sps:$4 sm:$0xff]   ;;  %v4832_v6 = vld [vmem:[%s5977_s1 + $0x120] ss:$8 sps:$4 sm:$0xff]   ;;  %v4841_v8 = vld [vmem:[%s5977_s1 + $0x114] ss:$8 sps:$4 sm:$0xff]  }
  0x1f   :  { %532 = vmatpush1.bf16.msra.mxu1 %v4297_v3  ;;  %367 = vmatprep.subr.bf16.mxu0 %v4823_v4  ;;  %v4303_v7 = vld [vmem:[%s5977_s1 + $0x60] ss:$8 sps:$4 sm:$0xff]   ;;  %v4306_v9 = vld [vmem:[%s5977_s1 + $0x54] ss:$8 sps:$4 sm:$0xff]   ;;  %v4849_v10 = vld [vmem:[%s5977_s1 + $0x110] ss:$8 sps:$4 sm:$0xff]  }
  0x20   :  { %533 = vmatprep.subr.bf16.mxu1 %v4300_v5  ;;  %v4309_v11 = vld [vmem:[%s5977_s1 + $0x50] ss:$8 sps:$4 sm:$0xff]   ;;  %v4858_v12 = vld [vmem:[%s5977_s1 + $0x104] ss:$8 sps:$4 sm:$0xff]   ;;  %v4867_v14 = vld [vmem:[%s5977_s1 + $0x100] ss:$8 sps:$4 sm:$0xff]  }
  0x21   :  { %v4312_v13 = vld [vmem:[%s5977_s1 + $0x44] ss:$8 sps:$4 sm:$0xff]   ;;  %v4315_v15 = vld [vmem:[%s5977_s1 + $0x40] ss:$8 sps:$4 sm:$0xff]   ;;  %v4876_v16 = vld [vmem:[%s5977_s1 + $0xf4] ss:$8 sps:$4 sm:$0xff]  }
  0x22   :  { %368 = vmatpush1.bf16.msra.mxu0 %v4832_v6  ;;  %v4318_v17 = vld [vmem:[%s5977_s1 + $0x34] ss:$8 sps:$4 sm:$0xff]   ;;  %v4885_v18 = vld [vmem:[%s5977_s1 + $0xf0] ss:$8 sps:$4 sm:$0xff]   ;;  %v4894_v20 = vld [vmem:[%s5977_s1 + $0xe4] ss:$8 sps:$4 sm:$0xff]  }
  0x23   :  { %534 = vmatpush1.bf16.msra.mxu1 %v4303_v7  ;;  %369 = vmatprep.subr.bf16.mxu0 %v4841_v8  ;;  %v4321_v19 = vld [vmem:[%s5977_s1 + $0x30] ss:$8 sps:$4 sm:$0xff]   ;;  %v4324_v21 = vld [vmem:[%s5977_s1 + $0x24] ss:$8 sps:$4 sm:$0xff]   ;;  %v4903_v22 = vld [vmem:[%s5977_s1 + $0xe0] ss:$8 sps:$4 sm:$0xff]  }
  0x24   :  { %535 = vmatprep.subr.bf16.mxu1 %v4306_v9  ;;  %v4327_v23 = vld [vmem:[%s5977_s1 + $0x20] ss:$8 sps:$4 sm:$0xff]   ;;  %v4912_v24 = vld [vmem:[%s5977_s1 + $0xd4] ss:$8 sps:$4 sm:$0xff]   ;;  %v4921_v26 = vld [vmem:[%s5977_s1 + $0xd0] ss:$8 sps:$4 sm:$0xff]  }
  0x25   :  { %v4330_v25 = vld [vmem:[%s5977_s1 + $0x14] ss:$8 sps:$4 sm:$0xff]   ;;  %v4333_v27 = vld [vmem:[%s5977_s1 + $0x10] ss:$8 sps:$4 sm:$0xff]   ;;  %v4930_v28 = vld [vmem:[%s5977_s1 + $0xc4] ss:$8 sps:$4 sm:$0xff]  }
  0x26   :  { %370 = vmatpush1.bf16.msra.mxu0 %v4849_v10  ;;  %v4336_v29 = vld [vmem:[%s5977_s1 + $0x4] ss:$8 sps:$4 sm:$0xff]   ;;  %v4939_v30 = vld [vmem:[%s5977_s1 + $0xc0] ss:$8 sps:$4 sm:$0xff]   ;;  %v4948_v32 = vld [vmem:[%s5977_s1 + $0x174] ss:$8 sps:$4 sm:$0xff]  }
  0x27   :  { %536 = vmatpush1.bf16.msra.mxu1 %v4309_v11  ;;  %371 = vmatprep.subr.bf16.mxu0 %v4858_v12  ;;  %v4339_v31 = vld [vmem:[%s5977_s1] ss:$8 sps:$4 sm:$0xff]   ;;  %v4342_v33 = vld [vmem:[%s5977_s1 + $0xb4] ss:$8 sps:$4 sm:$0xff]   ;;  %v4957_v34 = vld [vmem:[%s5977_s1 + $0x170] ss:$8 sps:$4 sm:$0xff]  }
  0x28   :  { %537 = vmatprep.subr.bf16.mxu1 %v4312_v13  ;;  %v4345_v35 = vld [vmem:[%s5977_s1 + $0xb0] ss:$8 sps:$4 sm:$0xff]   ;;  %v3502_v36 = vld [vmem:[%s5976_s0 + $0x28] sm:$0xff]  ;;  %vm361_vm0 = vcmask 523264   ;;  %v4997_v46 = vld [vmem:[%s5977_s1 + $0x154] ss:$8 sps:$4 sm:$0xff]  }
  0x29   :  { %v3504_v37 = vld [vmem:[%s5976_s0 + $0xa8] sm:$0xff]  ;;  %v4354_v47 = vld [vmem:[%s5977_s1 + $0x94] ss:$8 sps:$4 sm:$0xff]   ;;  %v5007_v48 = vld [vmem:[%s5977_s1 + $0x150] ss:$8 sps:$4 sm:$0xff]   ;;  %vm105_vm1 = vcmask 1046528  }
  0x2a   :  { %372 = vmatpush1.bf16.msra.mxu0 %v4867_v14  ;;  %v63_v38 = vld [vmem:[%s5976_s0 + $0x8] sm:$0xff]  ;;  %v74_v41 = vpack.c.bf16 %v3504_v37, %v3502_v36  ;;  %v4357_v49 = vld [vmem:[%s5977_s1 + $0x90] ss:$8 sps:$4 sm:$0xff]   ;;  %v3501_v54 = vld [vmem:[%s5976_s0 + $0x20] sm:$0xff]  ;;  %vm2267_vm3 = vcmask 1045504   ;;  %vm4745_vm4 = vmmov 0  }
  0x2b   :  { %538 = vmatpush1.bf16.msra.mxu1 %v4315_v15  ;;  %373 = vmatprep.subr.bf16.mxu0 %v4876_v16  ;;  %v4976_v39 = vld [vmem:[%s5977_s1 + $0x164] ss:$8 sps:$4 sm:$0xff]   ;;  %v4987_v44 = vld [vmem:[%s5977_s1 + $0x160] ss:$8 sps:$4 sm:$0xff]   ;;  %v5046_v58 = vld [vmem:[%s5977_s1 + $0x1f4] ss:$8 sps:$4 sm:$0xff]  }
  0x2c   :  { %539 = vmatprep.subr.bf16.mxu1 %v4318_v17  ;;  %v4348_v40 = vld [vmem:[%s5977_s1 + $0xa4] ss:$8 sps:$4 sm:$0xff]   ;;  %v4351_v45 = vld [vmem:[%s5977_s1 + $0xa0] ss:$8 sps:$4 sm:$0xff]   ;;  %3577 = vmatprep.mubr.msk.bf16.mxu0 %vm361_vm0, %v74_v41  ;;  %v4369_v59 = vld [vmem:[%s5977_s1 + $0x2b4] ss:$8 sps:$4 sm:$0xff]  }
  0x2d   :  { %v65_v42 = vld [vmem:[%s5976_s0 + $0x88] sm:$0xff]  ;;  %v3503_v55 = vld [vmem:[%s5976_s0 + $0xa0] sm:$0xff]  ;;  %v5055_v62 = vld [vmem:[%s5977_s1 + $0x1f0] ss:$8 sps:$4 sm:$0xff]   ;;  %vm2511_vm5 = vcmask 1041409  }
  0x2e   :  { %374 = vmatpush1.bf16.msra.mxu0 %v4885_v18  ;;  %v67_v43 = vpack.c.bf16 %v65_v42, %v63_v38  ;;  %v5016_v50 = vld [vmem:[%s5977_s1 + $0x144] ss:$8 sps:$4 sm:$0xff]   ;;  %v5025_v52 = vld [vmem:[%s5977_s1 + $0x140] ss:$8 sps:$4 sm:$0xff]   ;;  %v73_v60 = vpack.c.bf16 %v3503_v55, %v3501_v54  ;;  %v4367_v63 = vld [vmem:[%s5977_s1 + $0x2b0] ss:$8 sps:$4 sm:$0xff]  }
  0x2f   :  { %540 = vmatpush1.bf16.msra.mxu1 %v4321_v19  ;;  %375 = vmatprep.subr.bf16.mxu0 %v4894_v20  ;;  %v4360_v51 = vld [vmem:[%s5977_s1 + $0x84] ss:$8 sps:$4 sm:$0xff]   ;;  %v4363_v53 = vld [vmem:[%s5977_s1 + $0x80] ss:$8 sps:$4 sm:$0xff]   ;;  %v5082_v9 = vld [vmem:[%s5977_s1 + $0x1d4] ss:$8 sps:$4 sm:$0xff]  }
  0x30   :  { %541 = vmatprep.subr.bf16.mxu1 %v4324_v21  ;;  %3602 = vmatprep.mubr.msk.bf16.mxu1 %vm361_vm0, %v67_v43  ;;  %v62_v56 = vld [vmem:[%s5976_s0] sm:$0xff]  ;;  %v4381_v11 = vld [vmem:[%s5977_s1 + $0x294] ss:$8 sps:$4 sm:$0xff]   ;;  %v5091_v13 = vld [vmem:[%s5977_s1 + $0x1d0] ss:$8 sps:$4 sm:$0xff]  }
  0x31   :  { %v64_v57 = vld [vmem:[%s5976_s0 + $0x80] sm:$0xff]  ;;  %v4379_v15 = vld [vmem:[%s5977_s1 + $0x290] ss:$8 sps:$4 sm:$0xff]   ;;  %v3506_v36 = vld [vmem:[%s5976_s0 + $0x48] sm:$0xff] }
  0x32   :  { %376 = vmatpush1.bf16.msra.mxu0 %v4903_v22  ;;  %v66_v61 = vpack.c.bf16 %v64_v57, %v62_v56  ;;  %v5064_v1 = vld [vmem:[%s5977_s1 + $0x1e4] ss:$8 sps:$4 sm:$0xff]   ;;  %v5073_v5 = vld [vmem:[%s5977_s1 + $0x1e0] ss:$8 sps:$4 sm:$0xff]   ;;  %v5166_v43 = vld [vmem:[%s5977_s1 + $0x194] ss:$8 sps:$4 sm:$0xff]  }
  0x33   :  { %542 = vmatpush1.bf16.msra.mxu1 %v4327_v23  ;;  %377 = vmatprep.subr.bf16.mxu0 %v4912_v24  ;;  %v4375_v3 = vld [vmem:[%s5977_s1 + $0x2a4] ss:$8 sps:$4 sm:$0xff]   ;;  %v4373_v7 = vld [vmem:[%s5977_s1 + $0x2a0] ss:$8 sps:$4 sm:$0xff]  }
  0x34   :  { %543 = vmatprep.subr.bf16.mxu1 %v4330_v25  ;;  %v5100_v17 = vld [vmem:[%s5977_s1 + $0x1c4] ss:$8 sps:$4 sm:$0xff]   ;;  %v5109_v21 = vld [vmem:[%s5977_s1 + $0x1c0] ss:$8 sps:$4 sm:$0xff]   ;;  %v5118_v25 = vld [vmem:[%s5977_s1 + $0x1b4] ss:$8 sps:$4 sm:$0xff]  }
  0x35   :  { %v4387_v19 = vld [vmem:[%s5977_s1 + $0x284] ss:$8 sps:$4 sm:$0xff]   ;;  %v4385_v23 = vld [vmem:[%s5977_s1 + $0x280] ss:$8 sps:$4 sm:$0xff]  }
  0x36   :  { %378 = vmatpush1.bf16.msra.mxu0 %v4921_v26  ;;  %v3508_v37 = vld [vmem:[%s5976_s0 + $0xc8] sm:$0xff] }
  0x37   :  { %544 = vmatpush1.bf16.msra.mxu1 %v4333_v27  ;;  %379 = vmatprep.subr.bf16.mxu0 %v4930_v28  ;;  %v4393_v27 = vld [vmem:[%s5977_s1 + $0x274] ss:$8 sps:$4 sm:$0xff]   ;;  %v3510_v38 = vld [vmem:[%s5976_s0 + $0x68] sm:$0xff] }
  0x38   :  { %545 = vmatprep.subr.bf16.mxu1 %v4336_v29  ;;  %v5127_v29 = vld [vmem:[%s5977_s1 + $0x1b0] ss:$8 sps:$4 sm:$0xff]   ;;  %v5158_v41 = vld [vmem:[%s5977_s1 + $0x1a0] ss:$8 sps:$4 sm:$0xff]   ;;  %v5192_v54 = vld [vmem:[%s5977_s1 + $0x184] ss:$8 sps:$4 sm:$0xff]  }
  0x39   :  { %v4397_v42 = vld [vmem:[%s5977_s1 + $0x260] ss:$8 sps:$4 sm:$0xff]   ;;  %v4411_v55 = vld [vmem:[%s5977_s1 + $0x244] ss:$8 sps:$4 sm:$0xff]  }
  0x3a   :  { %380 = vmatpush1.bf16.msra.mxu0 %v4939_v30  ;;  %v5201_v56 = vld [vmem:[%s5977_s1 + $0x180] ss:$8 sps:$4 sm:$0xff]  }
  0x3b   :  { %546 = vmatpush1.bf16.msra.mxu1 %v4339_v31  ;;  %389 = vmatprep.subr.bf16.mxu0 %v4948_v32  ;;  %v4391_v31 = vld [vmem:[%s5977_s1 + $0x270] ss:$8 sps:$4 sm:$0xff]   ;;  %v4409_v57 = vld [vmem:[%s5977_s1 + $0x240] ss:$8 sps:$4 sm:$0xff]  }
  0x3c   :  { %555 = vmatprep.subr.bf16.mxu1 %v4342_v33  ;;  %v5136_v33 = vld [vmem:[%s5977_s1 + $0x1a4] ss:$8 sps:$4 sm:$0xff]  }
  0x3e   :  { %390 = vmatpush2.bf16.msra.mxu0 %v4957_v34 }
  0x3f   :  { %556 = vmatpush2.bf16.msra.mxu1 %v4345_v35  ;;  %391 = vmatprep.subr.bf16.mxu0 %v4976_v39  ;;  %v4399_v35 = vld [vmem:[%s5977_s1 + $0x264] ss:$8 sps:$4 sm:$0xff]  }
  0x40   :  { %557 = vmatprep.subr.bf16.mxu1 %v4348_v40  ;;  %v3512_v40 = vld [vmem:[%s5976_s0 + $0xe8] sm:$0xff] }
  0x42   :  { %392 = vmatpush2.bf16.msra.mxu0 %v4987_v44 }
  0x43   :  { %558 = vmatpush2.bf16.msra.mxu1 %v4351_v45  ;;  %393 = vmatprep.subr.bf16.mxu0 %v4997_v46  ;;  %v5168_v45 = vpack.c.bf16 %v3508_v37, %v3506_v36  ;;  %v96_v36 = vld [vmem:[%s5976_s0 + $0x98] sm:$0x1] }
  0x44   :  { %559 = vmatprep.subr.bf16.mxu1 %v4354_v47  ;;  %v5170_v47 = vpack.c.bf16 %v3512_v40, %v3510_v38  ;;  %v5267_v37 = vld [vmem:[%s5977_s1 + $0x210] ss:$8 sps:$4 sm:$0xff]   ;;  %v5276_v40 = vld [vmem:[%s5977_s1 + $0x204] ss:$8 sps:$4 sm:$0xff]  }
  0x45   :  { %5993 = vst [vmem:[#allocation14_spill] sm:$0xff] %v5267_v37  ;;  %v4427_v38 = vld [vmem:[%s5977_s1 + $0x2d0] ss:$8 sps:$4 sm:$0xff]  }
  0x46   :  { %394 = vmatpush2.bf16.msra.mxu0 %v5007_v48 }
  0x47   :  { %560 = vmatpush2.bf16.msra.mxu1 %v4357_v49  ;;  %395 = vmatprep.subr.bf16.mxu0 %v5016_v50  ;;  %v4405_v49 = vld [vmem:[%s5977_s1 + $0x254] ss:$8 sps:$4 sm:$0xff]  }
  0x48   :  { %561 = vmatprep.subr.bf16.mxu1 %v4360_v51  ;;  %v5183_v51 = vld [vmem:[%s5977_s1 + $0x190] ss:$8 sps:$4 sm:$0xff]  }
  0x4a   :  { %396 = vmatpush2.bf16.msra.mxu0 %v5025_v52 }
  0x4b   :  { %562 = vmatpush2.bf16.msra.mxu1 %v4363_v53  ;;  %722 = vmatprep.subr.bf16.mxu0 %v5046_v58  ;;  %v4403_v53 = vld [vmem:[%s5977_s1 + $0x250] ss:$8 sps:$4 sm:$0xff]  }
  0x4c   :  { %917 = vmatprep.subr.bf16.mxu1 %v4369_v59  ;;  %v5210_v59 = vld [vmem:[%s5977_s1 + $0x234] ss:$8 sps:$4 sm:$0xff]  }
  0x4d   :  { %398 = vmatmul.mubr.bf16.vlgmr.msra.gmra.mxu0 %v73_v60  ;;  %v4417_v60 = vld [vmem:[%s5977_s1 + $0x2f4] ss:$8 sps:$4 sm:$0xff]  }
  0x4e   :  { %564 = vmatmul.mubr.bf16.vlgmr.msra.gmra.mxu1 %v66_v61  ;;  %723 = vmatpush1.bf16.msra.mxu0 %v5055_v62  ;;  %v5219_v61 = vld [vmem:[%s5977_s1 + $0x230] ss:$8 sps:$4 sm:$0xff]  }
  0x4f   :  { %918 = vmatpush1.bf16.msra.mxu1 %v4367_v63  ;;  %724 = vmatprep.subr.bf16.mxu0 %v5064_v1  ;;  %v4415_v63 = vld [vmem:[%s5977_s1 + $0x2f0] ss:$8 sps:$4 sm:$0xff]  }
  0x50   :  { %919 = vmatprep.subr.bf16.mxu1 %v4375_v3  ;;  %3651 = vmatprep.mubr.msk.bf16.mxu0 %vm361_vm0, %v5168_v45  ;;  %v5228_v3 = vld [vmem:[%s5977_s1 + $0x224] ss:$8 sps:$4 sm:$0xff]  }
  0x51   :  { %3700 = vmatprep.mubr.msk.bf16.mxu1 %vm361_vm0, %v5170_v47 }
  0x52   :  { %725 = vmatpush1.bf16.msra.mxu0 %v5073_v5 }
  0x53   :  { %920 = vmatpush1.bf16.msra.mxu1 %v4373_v7  ;;  %726 = vmatprep.subr.bf16.mxu0 %v5082_v9  ;;  %v4423_v7 = vld [vmem:[%s5977_s1 + $0x2e4] ss:$8 sps:$4 sm:$0xff]  }
  0x54   :  { %921 = vmatprep.subr.bf16.mxu1 %v4381_v11  ;;  %v5237_v11 = vld [vmem:[%s5977_s1 + $0x220] ss:$8 sps:$4 sm:$0xff]  }
  0x55   :  { %5991 = vst [vmem:[#allocation12_spill] sm:$0xff] %v5237_v11 }
  0x56   :  { %727 = vmatpush1.bf16.msra.mxu0 %v5091_v13 }
  0x57   :  { %922 = vmatpush1.bf16.msra.mxu1 %v4379_v15  ;;  %728 = vmatprep.subr.bf16.mxu0 %v5100_v17  ;;  %v4421_v15 = vld [vmem:[%s5977_s1 + $0x2e0] ss:$8 sps:$4 sm:$0xff]  }
  0x58   :  { %923 = vmatprep.subr.bf16.mxu1 %v4387_v19  ;;  %v5246_v19 = vld [vmem:[%s5977_s1 + $0x214] ss:$8 sps:$4 sm:$0xff]  }
  0x59   :  { %5992 = vst [vmem:[#allocation13_spill] sm:$0xff] %v5246_v19 }
  0x5a   :  { %729 = vmatpush1.bf16.msra.mxu0 %v5109_v21 }
  0x5b   :  { %924 = vmatpush1.bf16.msra.mxu1 %v4385_v23  ;;  %730 = vmatprep.subr.bf16.mxu0 %v5118_v25  ;;  %v4429_v23 = vld [vmem:[%s5977_s1 + $0x2d4] ss:$8 sps:$4 sm:$0xff]  }
  0x5c   :  { %925 = vmatprep.subr.bf16.mxu1 %v4393_v27  ;;  %v90_v27 = vld [vmem:[%s5976_s0 + $0x8] sm:$0xfe] }
  0x5e   :  { %731 = vmatpush1.bf16.msra.mxu0 %v5127_v29 }
  0x5f   :  { %926 = vmatpush1.bf16.msra.mxu1 %v4391_v31  ;;  %732 = vmatprep.subr.bf16.mxu0 %v5136_v33  ;;  %v92_v31 = vld [vmem:[%s5976_s0 + $0x18] sm:$0x1] }
  0x60   :  { %927 = vmatprep.subr.bf16.mxu1 %v4399_v35  ;;  %v94_v35 = vld [vmem:[%s5976_s0 + $0x88] sm:$0xfe] }
  0x62   :  { %733 = vmatpush1.bf16.msra.mxu0 %v5158_v41 }
  0x63   :  { %928 = vmatpush1.bf16.msra.mxu1 %v4397_v42  ;;  %734 = vmatprep.subr.bf16.mxu0 %v5166_v43  ;;  %v4435_v42 = vld [vmem:[%s5977_s1 + $0x2c4] ss:$8 sps:$4 sm:$0xff]  }
  0x64   :  { %929 = vmatprep.subr.bf16.mxu1 %v4405_v49  ;;  %v109_v49 = vrot.slane %v90_v27, 1  ;;  %v3511_v27 = vld [vmem:[%s5976_s0 + $0xe0] sm:$0xff] }
  0x66   :  { %735 = vmatpush1.bf16.msra.mxu0 %v5183_v51 }
  0x67   :  { %930 = vmatpush1.bf16.msra.mxu1 %v4403_v53  ;;  %736 = vmatprep.subr.bf16.mxu0 %v5192_v54  ;;  %v110_v53 = vrot.slane %v92_v31, 1  ;;  %v5305_v31 = vld [vmem:[%s5977_s1 + $0x374] ss:$8 sps:$4 sm:$0xff]  }
  0x68   :  { %931 = vmatprep.subr.bf16.mxu1 %v4411_v55  ;;  %v115_v55 = vrot.slane %v94_v35, 1  ;;  %v5312_v35 = vld [vmem:[%s5977_s1 + $0x370] ss:$8 sps:$4 sm:$0xff]  }
  0x6a   :  { %737 = vmatpush1.bf16.msra.mxu0 %v5201_v56 }
  0x6b   :  { %932 = vmatpush1.bf16.msra.mxu1 %v4409_v57  ;;  %746 = vmatprep.subr.bf16.mxu0 %v5210_v59  ;;  %v116_v57 = vrot.slane %v96_v36, 1 }
  0x6c   :  { %941 = vmatprep.subr.bf16.mxu1 %v4417_v60  ;;  %v5285_v60 = vld [vmem:[%s5977_s1 + $0x200] ss:$8 sps:$4 sm:$0xff]  }
  0x6e   :  { %747 = vmatpush2.bf16.msra.mxu0 %v5219_v61 }
  0x6f   :  { %942 = vmatpush2.bf16.msra.mxu1 %v4415_v63  ;;  %748 = vmatprep.subr.bf16.mxu0 %v5228_v3  ;;  %v4433_v63 = vld [vmem:[%s5977_s1 + $0x2c0] ss:$8 sps:$4 sm:$0xff]  }
  0x70   :  { %943 = vmatprep.subr.bf16.mxu1 %v4423_v7  ;;  %v3505_v7 = vld [vmem:[%s5976_s0 + $0x40] sm:$0xff] }
  0x72   :  { %749 = vmatpush2.bf16.msra.mxu0 %v5237_v11  ;;  %v5321_v11 = vld [vmem:[%s5977_s1 + $0x364] ss:$8 sps:$4 sm:$0xff]  }
  0x73   :  { %944 = vmatpush2.bf16.msra.mxu1 %v4421_v15  ;;  %750 = vmatprep.subr.bf16.mxu0 %v5246_v19  ;;  %v3507_v15 = vld [vmem:[%s5976_s0 + $0xc0] sm:$0xff] }
  0x74   :  { %945 = vmatprep.subr.bf16.mxu1 %v4429_v23  ;;  %v3509_v23 = vld [vmem:[%s5976_s0 + $0x60] sm:$0xff]  ;;  %v5314_v36 = vpack.c.bf16 %v3507_v15, %v3505_v7 }
  0x75   :  { %v5316_v19 = vpack.c.bf16 %v3511_v27, %v3509_v23 }
  0x76   :  { %751 = vmatpush2.bf16.msra.mxu0 %v5267_v37  ;;  %v111_v37 = vsel %vm105_vm1, %v109_v49, %v110_v53  ;;  %v5340_v49 = vld [vmem:[%s5977_s1 + $0x354] ss:$8 sps:$4 sm:$0xff]   ;;  %v5407_v53 = vld [vmem:[%s5976_s0 + $0x28] sm:$0xfe] }
  0x77   :  { %946 = vmatpush2.bf16.msra.mxu1 %v4427_v38  ;;  %752 = vmatprep.subr.bf16.mxu0 %v5276_v40  ;;  %v117_v38 = vsel %vm105_vm1, %v115_v55, %v116_v57  ;;  %v5412_v55 = vld [vmem:[%s5976_s0 + $0x38] sm:$0x1]  ;;  %v5417_v57 = vld [vmem:[%s5977_s1 + $0x320] ss:$8 sps:$4 sm:$0xff]  }
  0x78   :  { %947 = vmatprep.subr.bf16.mxu1 %v4435_v42  ;;  %v5331_v42 = vld [vmem:[%s5977_s1 + $0x360] ss:$8 sps:$4 sm:$0xff]   ;;  %v5333_v7 = vpack.c.bf16 %v117_v38, %v111_v37  ;;  %v5358_v37 = vld [vmem:[%s5977_s1 + $0x344] ss:$8 sps:$4 sm:$0xff]   ;;  %v143_v38 = vrot.slane %v5407_v53, 1 }
  0x7a   :  { %753 = vmatpush2.bf16.msra.mxu0 %v5285_v60 }
  0x7b   :  { %948 = vmatpush2.bf16.msra.mxu1 %v4433_v63  ;;  %1112 = vmatprep.subr.bf16.mxu0 %v5305_v31 }
  0x7c   :  { %1159 = vmatprep.subr.bf16.mxu1 %v4806_v0  ;;  %v5349_v0 = vld [vmem:[%s5977_s1 + $0x350] ss:$8 sps:$4 sm:$0xff]  }
  0x7d   :  { %755 = vmatmul.mubr.bf16.vlgmr.msra.gmra.mxu0 %v5314_v36 }
  0x7e   :  { %950 = vmatmul.mubr.bf16.vlgmr.msra.gmra.mxu1 %v5316_v19  ;;  %1113 = vmatpush1.bf16.msra.mxu0 %v5312_v35 }
  0x7f   :  { %1160 = vmatpush1.bf16.msra.mxu1 %v4815_v2  ;;  %1114 = vmatprep.subr.bf16.mxu0 %v5321_v11  ;;  %v5369_v2 = vld [vmem:[%s5977_s1 + $0x340] ss:$8 sps:$4 sm:$0xff]  }
  0x80   :  { %1161 = vmatprep.subr.bf16.mxu1 %v4823_v4  ;;  %3749 = vmatprep.mubr.msk.bf16.mxu0 %vm361_vm0, %v5333_v7  ;;  %5994 = vst [vmem:[#allocation15_spill] sm:$0xff] %v5369_v2  ;;  %v5376_v4 = vld [vmem:[%s5977_s1 + $0x334] ss:$8 sps:$4 sm:$0xff]  }
  0x81   :  { %3750 = vmatprep.mubr.msk.bf16.mxu1 %vm361_vm0, %v5170_v47  ;;  %5995 = vst [vmem:[#allocation16_spill] sm:$0xff] %v5376_v4  ;;  %v95_v47 = vld [vmem:[%s5976_s0 + $0x90] sm:$0x1] }
  0x82   :  { %1115 = vmatpush1.bf16.msra.mxu0 %v5331_v42  ;;  %v113_v27 = vrot.slane %v95_v47, 1  ;;  %v4639_v47 = vld [vmem:[%s5977_s1 + $0x10] ss:$8 sps:$4 sm:$0xff]  }
  0x83   :  { %1162 = vmatpush1.bf16.msra.mxu1 %v4832_v6  ;;  %1116 = vmatprep.subr.bf16.mxu0 %v5340_v49  ;;  %v5381_v6 = vld [vmem:[%s5977_s1 + $0x330] ss:$8 sps:$4 sm:$0xff]  }
  0x84   :  { %1163 = vmatprep.subr.bf16.mxu1 %v4841_v8  ;;  %v89_v8 = vld [vmem:[%s5976_s0] sm:$0xfe] }
  0x85   :  { %v106_v63 = vrot.slane %v89_v8, 1  ;;  %v5438_v8 = vld [vmem:[%s5977_s1 + $0x304] ss:$8 sps:$4 sm:$0xff]  }
  0x86   :  { %1117 = vmatpush1.bf16.msra.mxu0 %v5349_v0 }
  0x87   :  { %1164 = vmatpush1.bf16.msra.mxu1 %v4849_v10  ;;  %1118 = vmatprep.subr.bf16.mxu0 %v5358_v37  ;;  %v91_v10 = vld [vmem:[%s5976_s0 + $0x10] sm:$0x1] }
  0x88   :  { %1165 = vmatprep.subr.bf16.mxu1 %v4858_v12  ;;  %v93_v12 = vld [vmem:[%s5976_s0 + $0x80] sm:$0xfe]  ;;  %v107_v15 = vrot.slane %v91_v10, 1 }
  0x89   :  { %v112_v23 = vrot.slane %v93_v12, 1  ;;  %v4638_v12 = vld [vmem:[%s5977_s1 + $0x14] ss:$8 sps:$4 sm:$0xff]  }
  0x8a   :  { %1119 = vmatpush1.bf16.msra.mxu0 %v5369_v2  ;;  %v5433_v2 = vld [vmem:[%s5977_s1 + $0x310] ss:$8 sps:$4 sm:$0xff]  }
  0x8b   :  { %1166 = vmatpush1.bf16.msra.mxu1 %v4867_v14  ;;  %1120 = vmatprep.subr.bf16.mxu0 %v5376_v4  ;;  %v5402_v14 = vld [vmem:[%s5977_s1 + $0x324] ss:$8 sps:$4 sm:$0xff]   ;;  %v144_v4 = vrot.slane %v5412_v55, 1  ;;  %v114_v10 = vsel %vm105_vm1, %v112_v23, %v113_v27  ;;  %v4651_v55 = vld [vmem:[%s5977_s1 + $0x2b0] ss:$8 sps:$4 sm:$0xff]  }
  0x8c   :  { %1167 = vmatprep.subr.bf16.mxu1 %v4876_v16  ;;  %v5422_v16 = vld [vmem:[%s5977_s1 + $0x314] ss:$8 sps:$4 sm:$0xff]   ;;  %v4640_v27 = vld [vmem:[%s5977_s1 + $0x4] ss:$8 sps:$4 sm:$0xff]  }
  0x8e   :  { %1121 = vmatpush1.bf16.msra.mxu0 %v5381_v6 }
  0x8f   :  { %1168 = vmatpush1.bf16.msra.mxu1 %v4885_v18  ;;  %1122 = vmatprep.subr.bf16.mxu0 %v5402_v14  ;;  %v5447_v18 = vld [vmem:[%s5977_s1 + $0x300] ss:$8 sps:$4 sm:$0xff]  }
  0x90   :  { %1169 = vmatprep.subr.bf16.mxu1 %v4894_v20  ;;  %v5452_v20 = vld [vmem:[%s5977_s1 + $0x3b4] ss:$8 sps:$4 sm:$0xff]  }
  0x92   :  { %1123 = vmatpush1.bf16.msra.mxu0 %v5417_v57 }
  0x93   :  { %1170 = vmatpush1.bf16.msra.mxu1 %v4903_v22  ;;  %1124 = vmatprep.subr.bf16.mxu0 %v5422_v16  ;;  %v5461_v22 = vld [vmem:[%s5977_s1 + $0x3b0] ss:$8 sps:$4 sm:$0xff]  }
  0x94   :  { %1171 = vmatprep.subr.bf16.mxu1 %v4912_v24  ;;  %v5466_v24 = vld [vmem:[%s5977_s1 + $0x3a4] ss:$8 sps:$4 sm:$0xff]  }
  0x96   :  { %1125 = vmatpush1.bf16.msra.mxu0 %v5433_v2 }
  0x97   :  { %1172 = vmatpush1.bf16.msra.mxu1 %v4921_v26  ;;  %1126 = vmatprep.subr.bf16.mxu0 %v5438_v8  ;;  %v5475_v26 = vld [vmem:[%s5977_s1 + $0x3a0] ss:$8 sps:$4 sm:$0xff]  }
  0x98   :  { %1173 = vmatprep.subr.bf16.mxu1 %v4930_v28  ;;  %v5480_v28 = vld [vmem:[%s5977_s1 + $0x394] ss:$8 sps:$4 sm:$0xff]  }
  0x9a   :  { %1127 = vmatpush1.bf16.msra.mxu0 %v5447_v18 }
  0x9b   :  { %1174 = vmatpush1.bf16.msra.mxu1 %v4939_v30  ;;  %1136 = vmatprep.subr.bf16.mxu0 %v5452_v20  ;;  %v5489_v30 = vld [vmem:[%s5977_s1 + $0x390] ss:$8 sps:$4 sm:$0xff]  }
  0x9c   :  { %1183 = vmatprep.subr.bf16.mxu1 %v4948_v32  ;;  %v5494_v32 = vld [vmem:[%s5977_s1 + $0x384] ss:$8 sps:$4 sm:$0xff]  }
  0x9e   :  { %1137 = vmatpush2.bf16.msra.mxu0 %v5461_v22 }
  0x9f   :  { %1184 = vmatpush2.bf16.msra.mxu1 %v4957_v34  ;;  %1138 = vmatprep.subr.bf16.mxu0 %v5466_v24  ;;  %v5503_v34 = vld [vmem:[%s5977_s1 + $0x380] ss:$8 sps:$4 sm:$0xff]  }
  0xa0   :  { %1185 = vmatprep.subr.bf16.mxu1 %v4976_v39  ;;  %v108_v39 = vsel %vm105_vm1, %v106_v63, %v107_v15 }
  0xa2   :  { %1139 = vmatpush2.bf16.msra.mxu0 %v5475_v26 }
  0xa3   :  { %1186 = vmatpush2.bf16.msra.mxu1 %v4987_v44  ;;  %1140 = vmatprep.subr.bf16.mxu0 %v5480_v28  ;;  %v5511_v44 = vpack.c.bf16 %v114_v10, %v108_v39  ;;  %v4641_v10 = vld [vmem:[%s5977_s1] ss:$8 sps:$4 sm:$0xff]  }
  0xa4   :  { %1187 = vmatprep.subr.bf16.mxu1 %v4997_v46  ;;  %v4626_v46 = vld [vmem:[%s5977_s1 + $0x74] ss:$8 sps:$4 sm:$0xff]  }
  0xa6   :  { %1141 = vmatpush2.bf16.msra.mxu0 %v5489_v30 }
  0xa7   :  { %1188 = vmatpush2.bf16.msra.mxu1 %v5007_v48  ;;  %1142 = vmatprep.subr.bf16.mxu0 %v5494_v32  ;;  %v4627_v48 = vld [vmem:[%s5977_s1 + $0x70] ss:$8 sps:$4 sm:$0xff]  }
  0xa8   :  { %1189 = vmatprep.subr.bf16.mxu1 %v5016_v50  ;;  %v4628_v50 = vld [vmem:[%s5977_s1 + $0x64] ss:$8 sps:$4 sm:$0xff]  }
  0xaa   :  { %1143 = vmatpush2.bf16.msra.mxu0 %v5503_v34 }
  0xab   :  { %1190 = vmatpush2.bf16.msra.mxu1 %v5025_v52  ;;  %1202 = vmatprep.subr.bf16.mxu0 %v4626_v46  ;;  %v4629_v52 = vld [vmem:[%s5977_s1 + $0x60] ss:$8 sps:$4 sm:$0xff]   ;;  %v4644_v46 = vld [vmem:[%s5977_s1 + $0xa4] ss:$8 sps:$4 sm:$0xff]  }
  0xac   :  { %1245 = vmatprep.subr.bf16.mxu1 %v5046_v58  ;;  %v4630_v58 = vld [vmem:[%s5977_s1 + $0x54] ss:$8 sps:$4 sm:$0xff]  }
  0xad   :  { %1145 = vmatmul.mubr.bf16.vlgmr.msra.gmra.mxu0 %v5511_v44 }
  0xae   :  { %1192 = vmatmul.mubr.bf16.vlgmr.msra.gmra.mxu1 %v5316_v19  ;;  %1203 = vmatpush1.bf16.msra.mxu0 %v4627_v48  ;;  %v3526_v19 = vld [vmem:[%s5976_s0 + $0xc8] sm:$0xfe]  ;;  %v4646_v48 = vld [vmem:[%s5977_s1 + $0x94] ss:$8 sps:$4 sm:$0xff]  }
  0xaf   :  { %1246 = vmatpush1.bf16.msra.mxu1 %v5055_v62  ;;  %1204 = vmatprep.subr.bf16.mxu0 %v4628_v50  ;;  %v4631_v62 = vld [vmem:[%s5977_s1 + $0x50] ss:$8 sps:$4 sm:$0xff]   ;;  %v183_v39 = vrot.slane %v3526_v19, 1  ;;  %v3525_v19 = vld [vmem:[%s5976_s0 + $0xc0] sm:$0xfe] }
  0xb0   :  { %1247 = vmatprep.subr.bf16.mxu1 %v5064_v1  ;;  %3751 = vmatprep.mubr.msk.bf16.mxu0 %vm361_vm0, %v5168_v45  ;;  %v4632_v1 = vld [vmem:[%s5977_s1 + $0x44] ss:$8 sps:$4 sm:$0xff]   ;;  %v4647_v50 = vld [vmem:[%s5977_s1 + $0x90] ss:$8 sps:$4 sm:$0xff]  }
  0xb1   :  { %3752 = vmatprep.mubr.msk.bf16.mxu1 %vm361_vm0, %v5333_v7  ;;  %v3522_v45 = vld [vmem:[%s5976_s0 + $0x48] sm:$0xfe]  ;;  %v3528_v7 = vld [vmem:[%s5976_s0 + $0xd8] sm:$0x1] }
  0xb2   :  { %1205 = vmatpush1.bf16.msra.mxu0 %v4629_v52  ;;  %v177_v15 = vrot.slane %v3522_v45, 1  ;;  %v4648_v52 = vld [vmem:[%s5977_s1 + $0x84] ss:$8 sps:$4 sm:$0xff]   ;;  %v4667_v45 = vld [vmem:[%s5977_s1 + $0x2f0] ss:$8 sps:$4 sm:$0xff]  }
  0xb3   :  { %1248 = vmatpush1.bf16.msra.mxu1 %v5073_v5  ;;  %1206 = vmatprep.subr.bf16.mxu0 %v4630_v58  ;;  %v4633_v5 = vld [vmem:[%s5977_s1 + $0x40] ss:$8 sps:$4 sm:$0xff]   ;;  %v145_v58 = vsel %vm105_vm1, %v143_v38, %v144_v4  ;;  %v4658_v38 = vld [vmem:[%s5977_s1 + $0x274] ss:$8 sps:$4 sm:$0xff]  }
  0xb4   :  { %1249 = vmatprep.subr.bf16.mxu1 %v5082_v9  ;;  %v4634_v9 = vld [vmem:[%s5977_s1 + $0x34] ss:$8 sps:$4 sm:$0xff]  }
  0xb6   :  { %1207 = vmatpush1.bf16.msra.mxu0 %v4631_v62 }
  0xb7   :  { %1250 = vmatpush1.bf16.msra.mxu1 %v5091_v13  ;;  %1208 = vmatprep.subr.bf16.mxu0 %v4632_v1  ;;  %v4635_v13 = vld [vmem:[%s5977_s1 + $0x30] ss:$8 sps:$4 sm:$0xff]  }
  0xb8   :  { %1251 = vmatprep.subr.bf16.mxu1 %v5100_v17  ;;  %v4636_v17 = vld [vmem:[%s5977_s1 + $0x24] ss:$8 sps:$4 sm:$0xff]  }
  0xba   :  { %1209 = vmatpush1.bf16.msra.mxu0 %v4633_v5 }
  0xbb   :  { %1252 = vmatpush1.bf16.msra.mxu1 %v5109_v21  ;;  %1210 = vmatprep.subr.bf16.mxu0 %v4634_v9  ;;  %v3518_v21 = vld [vmem:[%s5976_s0 + $0xa8] sm:$0xfe] }
  0xbc   :  { %1253 = vmatprep.subr.bf16.mxu1 %v5118_v25  ;;  %v3520_v25 = vld [vmem:[%s5976_s0 + $0xb8] sm:$0x1]  ;;  %v4649_v9 = vld [vmem:[%s5977_s1 + $0x80] ss:$8 sps:$4 sm:$0xff]  }
  0xbd   :  { %v150_v63 = vrot.slane %v3520_v25, 1  ;;  %v4666_v25 = vld [vmem:[%s5977_s1 + $0x2f4] ss:$8 sps:$4 sm:$0xff]  }
  0xbe   :  { %1211 = vmatpush1.bf16.msra.mxu0 %v4635_v13  ;;  %v1394_v13 = vlaneseq }
  0xbf   :  { %1254 = vmatpush1.bf16.msra.mxu1 %v5127_v29  ;;  %1212 = vmatprep.subr.bf16.mxu0 %v4636_v17  ;;  %v3524_v29 = vld [vmem:[%s5976_s0 + $0x58] sm:$0x1]  ;;  %v4661_v17 = vld [vmem:[%s5977_s1 + $0x260] ss:$8 sps:$4 sm:$0xff]  }
  0xc0   :  { %1255 = vmatprep.subr.bf16.mxu1 %v5136_v33  ;;  %v4637_v33 = vld [vmem:[%s5977_s1 + $0x20] ss:$8 sps:$4 sm:$0xff]   ;;  %v178_v23 = vrot.slane %v3524_v29, 1  ;;  %vm1422_vm2 = vcmp.lt.s32.totalorder %v1394_v13, 256 }
  0xc1   :  { %v3521_v29 = vld [vmem:[%s5976_s0 + $0x40] sm:$0xfe] }
  0xc2   :  { %1213 = vmatpush1.bf16.msra.mxu0 %v4637_v33  ;;  %v179_v1 = vsel %vm105_vm1, %v177_v15, %v178_v23  ;;  %v4668_v33 = vld [vmem:[%s5977_s1 + $0x2e4] ss:$8 sps:$4 sm:$0xff]   ;;  %v174_v15 = vrot.slane %v3521_v29, 1 }
  0xc3   :  { %1256 = vmatpush1.bf16.msra.mxu1 %v5158_v41  ;;  %1214 = vmatprep.subr.bf16.mxu0 %v4638_v12  ;;  %v149_v41 = vrot.slane %v3518_v21, 1  ;;  %v4744_v21 = vmov 0.0  }
  0xc4   :  { %1257 = vmatprep.subr.bf16.mxu1 %v5166_v43  ;;  %v184_v43 = vrot.slane %v3528_v7, 1  ;;  %1424 = vst.msk [vmem:[#allocation2] ss:$8 sm:$0x3] %vm1422_vm2, %v4744_v21  ;;  %v3527_v7 = vld [vmem:[%s5976_s0 + $0xd0] sm:$0x1] }
  0xc5   :  { %v151_v62 = vsel %vm105_vm1, %v149_v41, %v150_v63  ;;  %1427 = vst.msk [vmem:[#allocation2 + $0x20] ss:$8 sm:$0x3] %vm1422_vm2, %v4744_v21  ;;  %1430 = vst.msk [vmem:[#allocation2 + $0x40] ss:$8 sm:$0x3] %vm1422_vm2, %v4744_v21 }
  0xc6   :  { %1215 = vmatpush1.bf16.msra.mxu0 %v4639_v47  ;;  %v185_v5 = vsel %vm105_vm1, %v183_v39, %v184_v43  ;;  %v157_v4 = vpack.c.bf16 %v151_v62, %v145_v58  ;;  %1433 = vst.msk [vmem:[#allocation2 + $0x60] ss:$8 sm:$0x3] %vm1422_vm2, %v4744_v21  ;;  %1436 = vst.msk [vmem:[#allocation2 + $0x11] ss:$8 sm:$0x3] %vm1422_vm2, %v4744_v21 }
  0xc7   :  { %1258 = vmatpush1.bf16.msra.mxu1 %v5183_v51  ;;  %1216 = vmatprep.subr.bf16.mxu0 %v4640_v27  ;;  %v4642_v51 = vld [vmem:[%s5977_s1 + $0xb4] ss:$8 sps:$4 sm:$0xff]   ;;  %v191_v53 = vpack.c.bf16 %v185_v5, %v179_v1  ;;  %1442 = vst.msk [vmem:[#allocation2 + $0x51] ss:$8 sm:$0x3] %vm1422_vm2, %v4744_v21  ;;  %v180_v27 = vrot.slane %v3525_v19, 1 }
  0xc8   :  { %1259 = vmatprep.subr.bf16.mxu1 %v5192_v54  ;;  %v4643_v54 = vld [vmem:[%s5977_s1 + $0xb0] ss:$8 sps:$4 sm:$0xff]   ;;  %v181_v39 = vrot.slane %v3527_v7, 1  ;;  %v4670_v43 = vld [vmem:[%s5977_s1 + $0x2d4] ss:$8 sps:$4 sm:$0xff]   ;;  %v4478_v58 = vld [vmem:[#allocation3 + $0x60] sm:$0xff]  }
  0xc9   :  { %v4479_v62 = vld [vmem:[#allocation3 + $0x20] sm:$0xff]   ;;  %v4480_v1 = vld [vmem:[#allocation3 + $0x58] sm:$0xff]  }
  0xca   :  { %1217 = vmatpush1.bf16.msra.mxu0 %v4641_v10  ;;  %v4481_v5 = vld [vmem:[#allocation3 + $0x18] sm:$0xff]  }
  0xcb   :  { %1260 = vmatpush1.bf16.msra.mxu1 %v5201_v56  ;;  %1226 = vmatprep.subr.bf16.mxu0 %v4642_v51  ;;  %v4645_v56 = vld [vmem:[%s5977_s1 + $0xa0] ss:$8 sps:$4 sm:$0xff]   ;;  %v4671_v51 = vld [vmem:[%s5977_s1 + $0x2d0] ss:$8 sps:$4 sm:$0xff]  }
  0xcc   :  { %1269 = vmatprep.subr.bf16.mxu1 %v5210_v59  ;;  %v5996_v59 = vld [vmem:[#allocation12_spill] sm:$0xff] }
  0xce   :  { %1227 = vmatpush2.bf16.msra.mxu0 %v4643_v54 }
  0xcf   :  { %1270 = vmatpush2.bf16.msra.mxu1 %v5219_v61  ;;  %1228 = vmatprep.subr.bf16.mxu0 %v4644_v46  ;;  %v5997_v61 = vld [vmem:[#allocation13_spill] sm:$0xff]  ;;  %v182_v46 = vsel %vm105_vm1, %v180_v27, %v181_v39 }
  0xd0   :  { %1271 = vmatprep.subr.bf16.mxu1 %v5228_v3  ;;  %v5998_v3 = vld [vmem:[#allocation14_spill] sm:$0xff] }
  0xd2   :  { %1229 = vmatpush2.bf16.msra.mxu0 %v4645_v56  ;;  %v4672_v56 = vld [vmem:[%s5977_s1 + $0x2c4] ss:$8 sps:$4 sm:$0xff]  }
  0xd3   :  { %1272 = vmatpush2.bf16.msra.mxu1 %v5996_v59  ;;  %1230 = vmatprep.subr.bf16.mxu0 %v4646_v48 }
  0xd4   :  { %1273 = vmatprep.subr.bf16.mxu1 %v5997_v61  ;;  %v4473_v61 = vld [vmem:[#allocation3 + $0x38] sm:$0xff]  }
  0xd6   :  { %1231 = vmatpush2.bf16.msra.mxu0 %v4647_v50  ;;  %v4474_v50 = vld [vmem:[#allocation3 + $0x70] sm:$0xff]  }
  0xd7   :  { %1274 = vmatpush2.bf16.msra.mxu1 %v5998_v3  ;;  %1232 = vmatprep.subr.bf16.mxu0 %v4648_v52  ;;  %v4475_v3 = vld [vmem:[#allocation3 + $0x30] sm:$0xff]   ;;  %v4476_v52 = vld [vmem:[#allocation3 + $0x68] sm:$0xff]  }
  0xd8   :  { %1275 = vmatprep.subr.bf16.mxu1 %v5276_v40  ;;  %v4650_v40 = vld [vmem:[%s5977_s1 + $0x2b4] ss:$8 sps:$4 sm:$0xff]  }
  0xda   :  { %1233 = vmatpush2.bf16.msra.mxu0 %v4649_v9  ;;  %v4483_v9 = vld [vmem:[#allocation3 + $0x10] sm:$0xff]  }
  0xdb   :  { %1276 = vmatpush2.bf16.msra.mxu1 %v5285_v60  ;;  %1295 = vmatprep.subr.bf16.mxu0 %v4650_v40  ;;  %v4652_v60 = vld [vmem:[%s5977_s1 + $0x2a4] ss:$8 sps:$4 sm:$0xff]  }
  0xdc   :  { %1345 = vmatprep.subr.bf16.mxu1 %v5305_v31  ;;  %v4653_v31 = vld [vmem:[%s5977_s1 + $0x2a0] ss:$8 sps:$4 sm:$0xff]  }
  0xdd   :  { %1235 = vmatmul.mubr.bf16.vlgmr.msra.gmra.mxu0 %v5314_v36  ;;  %v4656_v36 = vld [vmem:[%s5977_s1 + $0x284] ss:$8 sps:$4 sm:$0xff]  }
  0xde   :  { %1278 = vmatmul.mubr.bf16.vlgmr.msra.gmra.mxu1 %v5511_v44  ;;  %1296 = vmatpush1.bf16.msra.mxu0 %v4651_v55  ;;  %v4659_v44 = vld [vmem:[%s5977_s1 + $0x270] ss:$8 sps:$4 sm:$0xff]   ;;  %v4484_v40 = vld [vmem:[#allocation3 + $0x48] sm:$0xff]   ;;  %v4487_v55 = vld [vmem:[#allocation3] sm:$0xff]  }
  0xdf   :  { %1346 = vmatpush1.bf16.msra.mxu1 %v5312_v35  ;;  %1297 = vmatprep.subr.bf16.mxu0 %v4652_v60  ;;  %v4654_v35 = vld [vmem:[%s5977_s1 + $0x294] ss:$8 sps:$4 sm:$0xff]  }
  0xe0   :  { %1347 = vmatprep.subr.bf16.mxu1 %v5321_v11  ;;  %3753 = vmatprep.mubr.msk.bf16.mxu0 %vm361_vm0, %v157_v4  ;;  %v4655_v11 = vld [vmem:[%s5977_s1 + $0x290] ss:$8 sps:$4 sm:$0xff]   ;;  %v4485_v4 = vld [vmem:[#allocation3 + $0x8] sm:$0xff]  }
  0xe1   :  { %3754 = vmatprep.mubr.msk.bf16.mxu1 %vm361_vm0, %v191_v53  ;;  %v4486_v53 = vld [vmem:[#allocation3 + $0x40] sm:$0xff]   ;;  %v4488_v60 = vld [vmem:[#allocation3 + $0xf8] sm:$0xff]  }
  0xe2   :  { %1298 = vmatpush1.bf16.msra.mxu0 %v4653_v31  ;;  %v4489_v31 = vld [vmem:[#allocation3 + $0xb8] sm:$0xff]  }
  0xe3   :  { %1348 = vmatpush1.bf16.msra.mxu1 %v5331_v42  ;;  %1299 = vmatprep.subr.bf16.mxu0 %v4654_v35  ;;  %v4657_v42 = vld [vmem:[%s5977_s1 + $0x280] ss:$8 sps:$4 sm:$0xff]   ;;  %v4490_v35 = vld [vmem:[#allocation3 + $0xf0] sm:$0xff]  }
  0xe4   :  { %1349 = vmatprep.subr.bf16.mxu1 %v5340_v49  ;;  %v5999_v49 = vld [vmem:[#allocation15_spill] sm:$0xff] }
  0xe6   :  { %1300 = vmatpush1.bf16.msra.mxu0 %v4655_v11  ;;  %v4491_v11 = vld [vmem:[#allocation3 + $0x1f8] sm:$0xff]  }
  0xe7   :  { %1350 = vmatpush1.bf16.msra.mxu1 %v5349_v0  ;;  %1301 = vmatprep.subr.bf16.mxu0 %v4656_v36  ;;  %v6000_v0 = vld [vmem:[#allocation16_spill] sm:$0xff]  ;;  %v4492_v36 = vld [vmem:[#allocation3 + $0xb0] sm:$0xff]  }
  0xe8   :  { %1351 = vmatprep.subr.bf16.mxu1 %v5358_v37  ;;  %v4660_v37 = vld [vmem:[%s5977_s1 + $0x264] ss:$8 sps:$4 sm:$0xff]  }
  0xea   :  { %1302 = vmatpush1.bf16.msra.mxu0 %v4657_v42  ;;  %v4494_v42 = vld [vmem:[#allocation3 + $0xe8] sm:$0xff]  }
  0xeb   :  { %1352 = vmatpush1.bf16.msra.mxu1 %v5999_v49  ;;  %1303 = vmatprep.subr.bf16.mxu0 %v4658_v38  ;;  %v4496_v49 = vld [vmem:[#allocation3 + $0xa8] sm:$0xff]  }
  0xec   :  { %1353 = vmatprep.subr.bf16.mxu1 %v6000_v0  ;;  %v4498_v0 = vld [vmem:[#allocation3 + $0xe0] sm:$0xff]  }
  0xee   :  { %1304 = vmatpush1.bf16.msra.mxu0 %v4659_v44  ;;  %v4500_v44 = vld [vmem:[#allocation3 + $0xa0] sm:$0xff]  }
  0xef   :  { %1354 = vmatpush1.bf16.msra.mxu1 %v5381_v6  ;;  %1305 = vmatprep.subr.bf16.mxu0 %v4660_v37  ;;  %v4662_v6 = vld [vmem:[%s5977_s1 + $0x254] ss:$8 sps:$4 sm:$0xff]  }
  0xf0   :  { %1355 = vmatprep.subr.bf16.mxu1 %v5402_v14  ;;  %v4663_v14 = vld [vmem:[%s5977_s1 + $0x250] ss:$8 sps:$4 sm:$0xff]  }
  0xf2   :  { %1306 = vmatpush1.bf16.msra.mxu0 %v4661_v17  ;;  %v4502_v17 = vld [vmem:[#allocation3 + $0xd8] sm:$0xff]  }
  0xf3   :  { %1356 = vmatpush1.bf16.msra.mxu1 %v5417_v57  ;;  %1307 = vmatprep.subr.bf16.mxu0 %v4662_v6  ;;  %v4664_v57 = vld [vmem:[%s5977_s1 + $0x244] ss:$8 sps:$4 sm:$0xff]  }
  0xf4   :  { %1357 = vmatprep.subr.bf16.mxu1 %v5422_v16  ;;  %v4665_v16 = vld [vmem:[%s5977_s1 + $0x240] ss:$8 sps:$4 sm:$0xff]  }
  0xf6   :  { %1308 = vmatpush1.bf16.msra.mxu0 %v4663_v14  ;;  %v4504_v14 = vld [vmem:[#allocation3 + $0x98] sm:$0xff]  }
  0xf7   :  { %1358 = vmatpush1.bf16.msra.mxu1 %v5433_v2  ;;  %1309 = vmatprep.subr.bf16.mxu0 %v4664_v57  ;;  %v3513_v2 = vld [vmem:[%s5976_s0 + $0x20] sm:$0xfe] }
  0xf8   :  { %1359 = vmatprep.subr.bf16.mxu1 %v5438_v8  ;;  %v3515_v8 = vld [vmem:[%s5976_s0 + $0x30] sm:$0x1]  ;;  %v140_v12 = vrot.slane %v3513_v2, 1 }
  0xf9   :  { %v141_v47 = vrot.slane %v3515_v8, 1  ;;  %v4508_v2 = vld [vmem:[#allocation3 + $0x90] sm:$0xff]  }
  0xfa   :  { %1310 = vmatpush1.bf16.msra.mxu0 %v4665_v16  ;;  %v4506_v16 = vld [vmem:[#allocation3 + $0xd0] sm:$0xff]  }
  0xfb   :  { %1360 = vmatpush1.bf16.msra.mxu1 %v5447_v18  ;;  %1319 = vmatprep.subr.bf16.mxu0 %v4666_v25  ;;  %v3517_v18 = vld [vmem:[%s5976_s0 + $0xa0] sm:$0xfe]  ;;  %v142_v10 = vsel %vm105_vm1, %v140_v12, %v141_v47  ;;  %v1395_v12 = vshrl.u32 %v1394_v13, 7 }
  0xfc   :  { %1369 = vmatprep.subr.bf16.mxu1 %v5452_v20  ;;  %v3519_v20 = vld [vmem:[%s5976_s0 + $0xb0] sm:$0x1]  ;;  %v146_v41 = vrot.slane %v3517_v18, 1  ;;  %v4512_v18 = vld [vmem:[#allocation3 + $0x88] sm:$0xff]  }
  0xfd   :  { %v147_v63 = vrot.slane %v3519_v20, 1  ;;  %v1396_v27 = vsub.s32 0, %v1395_v12 }
  0xfe   :  { %1320 = vmatpush2.bf16.msra.mxu0 %v4667_v45  ;;  %v4510_v45 = vld [vmem:[#allocation3 + $0xc8] sm:$0xff]  }
  0xff   :  { %1370 = vmatpush2.bf16.msra.mxu1 %v5461_v22  ;;  %1321 = vmatprep.subr.bf16.mxu0 %v4668_v33  ;;  %v3523_v22 = vld [vmem:[%s5976_s0 + $0x50] sm:$0x1]  ;;  %v4514_v33 = vld [vmem:[#allocation3 + $0xc0] sm:$0xff]  }
 0x100   :  { %1371 = vmatprep.subr.bf16.mxu1 %v5466_v24  ;;  %v4669_v24 = vld [vmem:[%s5977_s1 + $0x2e0] ss:$8 sps:$4 sm:$0xff]   ;;  %v175_v23 = vrot.slane %v3523_v22, 1 }
 0x101   :  { %v4516_v22 = vld [vmem:[#allocation3 + $0x80] sm:$0xff]  }
 0x102   :  { %1322 = vmatpush2.bf16.msra.mxu0 %v4669_v24  ;;  %v176_v54 = vsel %vm105_vm1, %v174_v15, %v175_v23 }
 0x103   :  { %1372 = vmatpush2.bf16.msra.mxu1 %v5475_v26  ;;  %1323 = vmatprep.subr.bf16.mxu0 %v4670_v43  ;;  %v148_v26 = vsel %vm105_vm1, %v146_v41, %v147_v63  ;;  %v190_v48 = vpack.c.bf16 %v182_v46, %v176_v54  ;;  %v4518_v63 = vld [vmem:[#allocation3 + $0x178] sm:$0xff]   ;;  %v1392_v43 = vld [vmem:[%s5981_s5] sm:$0x3] }
 0x104   :  { %1373 = vmatprep.subr.bf16.mxu1 %v5480_v28  ;;  %v4472_v28 = vld [vmem:[#allocation3 + $0x78] sm:$0xff]   ;;  %v156_v59 = vpack.c.bf16 %v148_v26, %v142_v10  ;;  %v1400_v26 = vsub.s32 1, %v1395_v12  ;;  %v4517_v12 = vld [vmem:[#allocation3 + $0x188] sm:$0xff]  }
 0x106   :  { %1324 = vmatpush2.bf16.msra.mxu0 %v4671_v51 }
 0x107   :  { %1374 = vmatpush2.bf16.msra.mxu1 %v5489_v30  ;;  %1325 = vmatprep.subr.bf16.mxu0 %v4672_v56  ;;  %v4673_v30 = vld [vmem:[%s5977_s1 + $0x2c0] ss:$8 sps:$4 sm:$0xff]  }
 0x108   :  { %1375 = vmatprep.subr.bf16.mxu1 %v5494_v32  ;;  %v4477_v32 = vld [vmem:[#allocation3 + $0x28] sm:$0xff]  }
 0x10a   :  { %1326 = vmatpush2.bf16.msra.mxu0 %v4673_v30 }
 0x10b   :  { %1376 = vmatpush2.bf16.msra.mxu1 %v5503_v34  ;;  %v4482_v34 = vld [vmem:[#allocation3 + $0x50] sm:$0xff]   ;;  %3914 = vmatprep.subr.bf16.mxu0 %v4488_v60 }
 0x10c   :  { %3936 = vmatprep.subr.bf16.mxu1 %v4472_v28  ;;  %v5782_v28 = vrot.slane %v1392_v43, %v1396_v27 }
 0x10d   :  { %1328 = vmatmul.mubr.bf16.vlgmr.msra.gmra.mxu0 %v156_v59  ;;  %v399_v38 = vpop.f32.mrf.mxu0 }
 0x10e   :  { %1378 = vmatmul.mubr.bf16.vlgmr.msra.gmra.mxu1 %v190_v48  ;;  %3915 = vmatpush3.bf16.msra.mxu0 %v4489_v31  ;;  %v565_v6 = vpop.f32.mrf.mxu1 }
 0x10f   :  { %3937 = vmatpush3.bf16.msra.mxu1 %v4473_v61  ;;  %3916 = vmatprep.subr.bf16.mxu0 %v4490_v35  ;;  %v401_v37 = vpop.f32.mrf.mxu0  ;;  %v566_v41 = vadd.f32 %v565_v6, %v399_v38 }
 0x110   :  { %3938 = vmatprep.subr.bf16.mxu1 %v4474_v50  ;;  %v567_v25 = vpop.f32.mrf.mxu1 }
 0x111   :  { %v403_v57 = vpop.f32.mrf.mxu0  ;;  %v568_v15 = vadd.f32 %v567_v25, %v401_v37  ;;  %v4495_v25 = vld [vmem:[#allocation3 + $0x1f0] sm:$0xff]  }
 0x112   :  { %3917 = vmatpush3.bf16.msra.mxu0 %v4492_v36  ;;  %v569_v20 = vpop.f32.mrf.mxu1 }
 0x113   :  { %3939 = vmatpush3.bf16.msra.mxu1 %v4475_v3  ;;  %3918 = vmatprep.subr.bf16.mxu0 %v4494_v42  ;;  %v405_v8 = vpop.f32.mrf.mxu0  ;;  %v570_v10 = vadd.f32 %v569_v20, %v403_v57  ;;  %v5784_v3 = vrot.slane %v1392_v43, %v1400_v26  ;;  %v4493_v57 = vld [vmem:[#allocation3 + $0x1b8] sm:$0xff]   ;;  %v4505_v20 = vld [vmem:[#allocation3 + $0x1a0] sm:$0xff]  }
 0x114   :  { %3940 = vmatprep.subr.bf16.mxu1 %v4476_v52  ;;  %v571_v19 = vpop.f32.mrf.mxu1 }
 0x115   :  { %v572_v46 = vadd.f32 %v571_v19, %v405_v8  ;;  %v4499_v8 = vld [vmem:[#allocation3 + $0x1e8] sm:$0xff]   ;;  %v4513_v19 = vld [vmem:[#allocation3 + $0x190] sm:$0xff]  }
 0x116   :  { %3919 = vmatpush3.bf16.msra.mxu0 %v4496_v49 }
 0x117   :  { %3941 = vmatpush3.bf16.msra.mxu1 %v4477_v32  ;;  %3920 = vmatprep.subr.bf16.mxu0 %v4498_v0 }
 0x118   :  { %3942 = vmatprep.subr.bf16.mxu1 %v4478_v58 }
 0x11a   :  { %3921 = vmatpush3.bf16.msra.mxu0 %v4500_v44 }
 0x11b   :  { %3943 = vmatpush3.bf16.msra.mxu1 %v4479_v62  ;;  %3922 = vmatprep.subr.bf16.mxu0 %v4502_v17 }
 0x11c   :  { %3944 = vmatprep.subr.bf16.mxu1 %v4480_v1 }
 0x11e   :  { %3923 = vmatpush3.bf16.msra.mxu0 %v4504_v14 }
 0x11f   :  { %3945 = vmatpush3.bf16.msra.mxu1 %v4481_v5  ;;  %3924 = vmatprep.subr.bf16.mxu0 %v4506_v16 }
 0x120   :  { %3946 = vmatprep.subr.bf16.mxu1 %v4482_v34 }
 0x122   :  { %3925 = vmatpush3.bf16.msra.mxu0 %v4508_v2  ;;  %v4497_v2 = vld [vmem:[#allocation3 + $0x1b0] sm:$0xff]  }
 0x123   :  { %3947 = vmatpush3.bf16.msra.mxu1 %v4483_v9  ;;  %3926 = vmatprep.subr.bf16.mxu0 %v4510_v45  ;;  %v4501_v45 = vld [vmem:[#allocation3 + $0x1a8] sm:$0xff]  }
 0x124   :  { %3948 = vmatprep.subr.bf16.mxu1 %v4484_v40 }
 0x126   :  { %3927 = vmatpush3.bf16.msra.mxu0 %v4512_v18  ;;  %v4503_v18 = vld [vmem:[#allocation3 + $0x1e0] sm:$0xff]  }
 0x127   :  { %3949 = vmatpush3.bf16.msra.mxu1 %v4485_v4  ;;  %3928 = vmatprep.subr.bf16.mxu0 %v4514_v33  ;;  %v4509_v33 = vld [vmem:[#allocation3 + $0x198] sm:$0xff]  }
 0x128   :  { %3950 = vmatprep.subr.bf16.mxu1 %v4486_v53 }
 0x12a   :  { %3929 = vmatpush3.bf16.msra.mxu0 %v4516_v22  ;;  %v4511_v22 = vld [vmem:[#allocation3 + $0x1d0] sm:$0xff]  }
 0x12b   :  { %3951 = vmatpush3.bf16.msra.mxu1 %v4487_v55  ;;  %3958 = vmatprep.subr.bf16.mxu0 %v4518_v63 }
 0x12c   :  { %3980 = vmatprep.subr.bf16.mxu1 %v4491_v11 }
 0x13d   :  { %v756_v29 = vpop.f32.mrf.mxu0 }
 0x13e   :  { %v951_v47 = vpop.f32.mrf.mxu1  ;;  %v765_v23 = vadd.f32 %v756_v29, %v566_v41  ;;  %v4507_v29 = vld [vmem:[#allocation3 + $0x1d8] sm:$0xff]   ;;  %v4521_v41 = vld [vmem:[#allocation3 + $0x180] sm:$0xff]  }
 0x13f   :  { %v758_v7 = vpop.f32.mrf.mxu0 }
 0x140   :  { %v953_v39 = vpop.f32.mrf.mxu1  ;;  %v766_v51 = vadd.f32 %v758_v7, %v568_v15  ;;  %v960_v13 = vadd.f32 %v951_v47, %v765_v23  ;;  %v4515_v7 = vld [vmem:[#allocation3 + $0x1c8] sm:$0xff]   ;;  %v4519_v47 = vld [vmem:[#allocation3 + $0x1c0] sm:$0xff]  }
 0x141   :  { %v760_v24 = vpop.f32.mrf.mxu0 }
 0x142   :  { %v767_v56 = vadd.f32 %v760_v24, %v570_v10  ;;  %v955_v59 = vpop.f32.mrf.mxu1  ;;  %v961_v30 = vadd.f32 %v953_v39, %v766_v51 }
 0x143   :  { %v762_v54 = vpop.f32.mrf.mxu0 }
 0x144   :  { %v768_v61 = vadd.f32 %v762_v54, %v572_v46  ;;  %v962_v32 = vadd.f32 %v955_v59, %v767_v56  ;;  %v957_v1 = vpop.f32.mrf.mxu1 }
 0x146   :  { %v963_v34 = vadd.f32 %v957_v1, %v768_v61 }
 0x16d   :  { %v1146_v48 = vpop.f32.mrf.mxu0 }
 0x16e   :  { %v1155_v50 = vadd.f32 %v1146_v48, %v960_v13  ;;  %v1193_v63 = vpop.f32.mrf.mxu1 }
 0x16f   :  { %v1148_v52 = vpop.f32.mrf.mxu0 }
 0x170   :  { %v1404_v58 = vadd.f32 %v5782_v28, %v1155_v50  ;;  %v1156_v62 = vadd.f32 %v1148_v52, %v961_v30  ;;  %v1195_v24 = vpop.f32.mrf.mxu1 }
 0x171   :  { %v1150_v5 = vpop.f32.mrf.mxu0 }
 0x172   :  { %v1408_v9 = vmax.f32 %v1404_v58, 0.0  ;;  %v1405_v40 = vadd.f32 %v5784_v3, %v1156_v62  ;;  %v1157_v4 = vadd.f32 %v1150_v5, %v962_v32  ;;  %v1197_v15 = vpop.f32.mrf.mxu1 }
 0x173   :  { %v1152_v53 = vpop.f32.mrf.mxu0 }
 0x174   :  { %v1451_v55 = vrot.slane %v1408_v9, 7  ;;  %v1409_v60 = vmax.f32 %v1405_v40, 0.0  ;;  %v1406_v31 = vadd.f32 %v5782_v28, %v1157_v4  ;;  %v1158_v35 = vadd.f32 %v1152_v53, %v963_v34  ;;  %v1199_v23 = vpop.f32.mrf.mxu1 }
 0x176   :  { %1459 = vst [vmem:[#allocation2] sm:$0xfe] %v1451_v55  ;;  %1461 = vst [vmem:[#allocation2 + $0x10] sm:$0x1] %v1451_v55  ;;  %v1452_v11 = vrot.slane %v1409_v60, 7  ;;  %v1410_v36 = vmax.f32 %v1406_v31, 0.0  ;;  %v1407_v42 = vadd.f32 %v5784_v3, %v1158_v35 }
 0x178   :  { %1460 = vst [vmem:[#allocation2 + $0x8] sm:$0xfe] %v1452_v11  ;;  %1462 = vst [vmem:[#allocation2 + $0x18] sm:$0x1] %v1452_v11  ;;  %v1453_v49 = vrot.slane %v1410_v36, 7  ;;  %v1411_v38 = vmax.f32 %v1407_v42, 0.0 }
 0x17a   :  { %1463 = vst [vmem:[#allocation2 + $0x40] sm:$0xfe] %v1453_v49  ;;  %1465 = vst [vmem:[#allocation2 + $0x50] sm:$0x1] %v1453_v49  ;;  %v1454_v0 = vrot.slane %v1411_v38, 7 }
 0x17c   :  { %1464 = vst [vmem:[#allocation2 + $0x48] sm:$0xfe] %v1454_v0  ;;  %1466 = vst [vmem:[#allocation2 + $0x58] sm:$0x1] %v1454_v0 }
 0x17d   :  { %v1488_v14 = vld [vmem:[#allocation2] sm:$0xff] }
 0x17f   :  { %v1489_v37 = vld [vmem:[#allocation2 + $0x8] sm:$0xff] }
 0x181   :  { %v1490_v44 = vld [vmem:[#allocation2 + $0x40] sm:$0xff] }
 0x182   :  { %v1492_v16 = vpack.c.bf16 %v1490_v44, %v1488_v14 }
 0x183   :  { %v1491_v17 = vld [vmem:[#allocation2 + $0x48] sm:$0xff] }
 0x184   :  { %v1493_v6 = vpack.c.bf16 %v1491_v17, %v1489_v37 }
 0x186   :  { %1830 = vmatprep.mubr.bf16.mxu1 %v1493_v6 }
 0x187   :  { %1831 = vmatmul.mubr.bf16.vlgmr.msra.gmra.mxu1 %v1492_v16 }
 0x188   :  { %3981 = vmatpush3.bf16.msra.mxu1 %v4493_v57 }
 0x189   :  { %3982 = vmatprep.subr.bf16.mxu1 %v4495_v25 }
 0x18c   :  { %3983 = vmatpush3.bf16.msra.mxu1 %v4497_v2  ;;  %v1844_v2 = vld [vmem:[#allocation2 + $0x48] sm:$0xfe] }
 0x18d   :  { %3984 = vmatprep.subr.bf16.mxu1 %v4499_v8  ;;  %v1846_v8 = vld [vmem:[#allocation2 + $0x58] sm:$0x1] }
 0x190   :  { %3985 = vmatpush3.bf16.msra.mxu1 %v4501_v45  ;;  %v1840_v45 = vld [vmem:[#allocation2 + $0x8] sm:$0xfe] }
 0x191   :  { %3986 = vmatprep.subr.bf16.mxu1 %v4503_v18 }
 0x194   :  { %3987 = vmatpush3.bf16.msra.mxu1 %v4505_v20  ;;  %v1864_v20 = vrot.slane %v1844_v2, 1 }
 0x195   :  { %3988 = vmatprep.subr.bf16.mxu1 %v4507_v29  ;;  %v1865_v29 = vrot.slane %v1846_v8, 1 }
 0x198   :  { %3989 = vmatpush3.bf16.msra.mxu1 %v4509_v33 }
 0x199   :  { %3990 = vmatprep.subr.bf16.mxu1 %v4511_v22 }
 0x19c   :  { %3991 = vmatpush3.bf16.msra.mxu1 %v4513_v19  ;;  %v1858_v19 = vrot.slane %v1840_v45, 1  ;;  %v4535_v45 = vld [vmem:[#allocation3 + $0x100] sm:$0xff]  }
 0x19d   :  { %3992 = vmatprep.subr.bf16.mxu1 %v4515_v7  ;;  %v1236_v27 = vpop.f32.mrf.mxu0 }
 0x19e   :  { %v1279_v39 = vpop.f32.mrf.mxu1  ;;  %v1237_v54 = vadd.f32 %v1236_v27, %v1193_v63 }
 0x19f   :  { %v1238_v43 = vpop.f32.mrf.mxu0 }
 0x1a0   :  { %3993 = vmatpush3.bf16.msra.mxu1 %v4517_v12  ;;  %v1281_v10 = vpop.f32.mrf.mxu1  ;;  %v1239_v46 = vadd.f32 %v1238_v43, %v1195_v24  ;;  %v1288_v59 = vadd.f32 %v1279_v39, %v1237_v54 }
 0x1a1   :  { %3994 = vmatprep.subr.bf16.mxu1 %v4519_v47  ;;  %v1240_v51 = vpop.f32.mrf.mxu0 }
 0x1a2   :  { %v1283_v26 = vpop.f32.mrf.mxu1  ;;  %v1241_v48 = vadd.f32 %v1240_v51, %v1197_v15  ;;  %v1289_v50 = vadd.f32 %v1281_v10, %v1239_v46  ;;  %v1866_v10 = vsel %vm105_vm1, %v1864_v20, %v1865_v29  ;;  %v4536_v20 = vld [vmem:[#allocation3 + $0x278] sm:$0xff]  }
 0x1a3   :  { %v1242_v13 = vpop.f32.mrf.mxu0 }
 0x1a4   :  { %3995 = vmatpush3.bf16.msra.mxu1 %v4521_v41  ;;  %v1285_v56 = vpop.f32.mrf.mxu1  ;;  %v1243_v52 = vadd.f32 %v1242_v13, %v1199_v23  ;;  %v1290_v1 = vadd.f32 %v1283_v26, %v1241_v48 }
 0x1a5   :  { %4105 = vmatprep.subr.bf16.mxu1 %v4744_v21 }
 0x1a6   :  { %v1291_v4 = vadd.f32 %v1285_v56, %v1243_v52  ;;  %v4520_v56 = vld [vmem:[#allocation3 + $0x138] sm:$0xff]  }
 0x1cd   :  { %v1329_v30 = vpop.f32.mrf.mxu0 }
 0x1ce   :  { %v1379_v61 = vpop.f32.mrf.mxu1  ;;  %v1338_v32 = vadd.f32 %v1329_v30, %v1288_v59 }
 0x1cf   :  { %v1331_v58 = vpop.f32.mrf.mxu0 }
 0x1d0   :  { %v1381_v62 = vpop.f32.mrf.mxu1  ;;  %v1388_v5 = vadd.f32 %v1379_v61, %v1338_v32  ;;  %v1339_v34 = vadd.f32 %v1331_v58, %v1289_v50  ;;  %v4522_v50 = vld [vmem:[#allocation3 + $0x170] sm:$0xff]  }
 0x1d1   :  { %v1333_v9 = vpop.f32.mrf.mxu0 }
 0x1d2   :  { %v1383_v40 = vpop.f32.mrf.mxu1  ;;  %v1412_v53 = vadd.f32 %v5782_v28, %v1388_v5  ;;  %v1389_v55 = vadd.f32 %v1381_v62, %v1339_v34  ;;  %v1340_v60 = vadd.f32 %v1333_v9, %v1290_v1  ;;  %v4523_v9 = vld [vmem:[#allocation3 + $0x130] sm:$0xff]  }
 0x1d3   :  { %v1335_v31 = vpop.f32.mrf.mxu0 }
 0x1d4   :  { %v1416_v35 = vmax.f32 %v1412_v53, 0.0  ;;  %v1413_v11 = vadd.f32 %v5784_v3, %v1389_v55  ;;  %v1390_v36 = vadd.f32 %v1383_v40, %v1340_v60  ;;  %v1341_v42 = vadd.f32 %v1335_v31, %v1291_v4  ;;  %v1385_v49 = vpop.f32.mrf.mxu1  ;;  %v4524_v40 = vld [vmem:[#allocation3 + $0x168] sm:$0xff]   ;;  %v4526_v53 = vld [vmem:[#allocation3 + $0x160] sm:$0xff]   ;;  %v4528_v60 = vld [vmem:[#allocation3 + $0x158] sm:$0xff]  }
 0x1d5   :  { %v4525_v4 = vld [vmem:[#allocation3 + $0x128] sm:$0xff]   ;;  %v4527_v55 = vld [vmem:[#allocation3 + $0x120] sm:$0xff]   ;;  %v4529_v31 = vld [vmem:[#allocation3 + $0x118] sm:$0xff]  }
 0x1d6   :  { %v1471_v38 = vrot.slane %v1416_v35, 7  ;;  %v1417_v0 = vmax.f32 %v1413_v11, 0.0  ;;  %v1414_v44 = vadd.f32 %v5782_v28, %v1390_v36  ;;  %v1391_v37 = vadd.f32 %v1385_v49, %v1341_v42  ;;  %v1842_v28 = vld [vmem:[#allocation2 + $0x18] sm:$0x1]  ;;  %v4530_v35 = vld [vmem:[#allocation3 + $0x150] sm:$0xff]   ;;  %v4532_v36 = vld [vmem:[#allocation3 + $0x148] sm:$0xff]  }
 0x1d7   :  { %v1859_v7 = vrot.slane %v1842_v28, 1  ;;  %v4531_v11 = vld [vmem:[#allocation3 + $0x110] sm:$0xff]   ;;  %v1843_v42 = vld [vmem:[#allocation2 + $0x40] sm:$0xfe] }
 0x1d8   :  { %1480 = vst [vmem:[#allocation2 + $0x20] sm:$0xfe] %v1471_v38  ;;  %1482 = vst [vmem:[#allocation2 + $0x30] sm:$0x1] %v1471_v38  ;;  %v1472_v17 = vrot.slane %v1417_v0, 7  ;;  %v1418_v6 = vmax.f32 %v1414_v44, 0.0  ;;  %v1415_v14 = vadd.f32 %v5784_v3, %v1391_v37 }
 0x1d9   :  { %v1860_v61 = vsel %vm105_vm1, %v1858_v19, %v1859_v7  ;;  %v1845_v49 = vld [vmem:[#allocation2 + $0x50] sm:$0x1]  ;;  %v4533_v38 = vld [vmem:[#allocation3 + $0x108] sm:$0xff]   ;;  %v2258_v44 = vld [vmem:[#allocation2 + $0x58] sm:$0x3] }
 0x1da   :  { %1481 = vst [vmem:[#allocation2 + $0x28] sm:$0xfe] %v1472_v17  ;;  %1483 = vst [vmem:[#allocation2 + $0x38] sm:$0x1] %v1472_v17  ;;  %v1473_v57 = vrot.slane %v1418_v6, 7  ;;  %v1419_v16 = vmax.f32 %v1415_v14, 0.0  ;;  %v1872_v32 = vpack.c.bf16 %v1866_v10, %v1860_v61 }
 0x1db   :  { %v2256_v0 = vld [vmem:[#allocation2 + $0x48] sm:$0xfc]  ;;  %v4534_v37 = vld [vmem:[#allocation3 + $0x140] sm:$0xff]   ;;  %v1841_v6 = vld [vmem:[#allocation2 + $0x10] sm:$0x1]  ;;  %v1861_v14 = vrot.slane %v1843_v42, 1 }
 0x1dc   :  { %1484 = vst [vmem:[#allocation2 + $0x60] sm:$0xfe] %v1473_v57  ;;  %1486 = vst [vmem:[#allocation2 + $0x70] sm:$0x1] %v1473_v57  ;;  %v1474_v25 = vrot.slane %v1419_v16, 7  ;;  %v1862_v57 = vrot.slane %v1845_v49, 1 }
 0x1dd   :  { %v1839_v17 = vld [vmem:[#allocation2] sm:$0xfe]  ;;  %v2252_v16 = vld [vmem:[#allocation2 + $0x8] sm:$0xfc]  ;;  %v2277_v2 = vrot.slane %v2256_v0, 2  ;;  %v2278_v8 = vrot.slane %v2258_v44, 2 }
 0x1de   :  { %1485 = vst [vmem:[#allocation2 + $0x68] sm:$0xfe] %v1474_v25  ;;  %1487 = vst [vmem:[#allocation2 + $0x78] sm:$0x1] %v1474_v25  ;;  %v2254_v25 = vld [vmem:[#allocation2 + $0x18] sm:$0x3] }
 0x1df   :  { %v2045_v18 = vld [vmem:[#allocation2 + $0x20] sm:$0xfe]  ;;  %v2047_v3 = vld [vmem:[#allocation2 + $0x30] sm:$0x1]  ;;  %v1855_v28 = vrot.slane %v1839_v17, 1  ;;  %v2271_v29 = vrot.slane %v2252_v16, 2  ;;  %v2279_v19 = vsel %vm2267_vm3, %v2277_v2, %v2278_v8 }
 0x1e0   :  { %v2061_v41 = vrot.slane %v2045_v18, 1  ;;  %v2062_v54 = vrot.slane %v2047_v3, 1  ;;  %v1526_v13 = vld [vmem:[#allocation2 + $0x20] sm:$0xff]  ;;  %v1856_v18 = vrot.slane %v1841_v6, 1  ;;  %v4537_v7 = vld [vmem:[#allocation3 + $0x238] sm:$0xff]   ;;  %v4563_v42 = vld [vmem:[#allocation6 + $0x10] sm:$0xff]  }
 0x1e1   :  { %v2046_v33 = vld [vmem:[#allocation2 + $0x28] sm:$0xfe]  ;;  %v2048_v22 = vld [vmem:[#allocation2 + $0x38] sm:$0x1]  ;;  %v4566_v0 = vld [vmem:[#allocation6 + $0x40] sm:$0xff]  }
 0x1e2   :  { %v1527_v63 = vld [vmem:[#allocation2 + $0x28] sm:$0xff]  ;;  %v2064_v15 = vrot.slane %v2046_v33, 1  ;;  %v2065_v23 = vrot.slane %v2048_v22, 1  ;;  %v2063_v5 = vsel %vm105_vm1, %v2061_v41, %v2062_v54  ;;  %v2272_v33 = vrot.slane %v2254_v25, 2  ;;  %v4538_v41 = vld [vmem:[#allocation3 + $0x270] sm:$0xff]   ;;  %v4545_v10 = vld [vmem:[#allocation3 + $0x218] sm:$0xff]  }
 0x1e3   :  { %v2049_v12 = vld [vmem:[#allocation2 + $0x60] sm:$0xfe]  ;;  %v2051_v47 = vld [vmem:[#allocation2 + $0x70] sm:$0x1]  ;;  %v1863_v22 = vsel %vm105_vm1, %v1861_v14, %v1862_v57  ;;  %v1857_v3 = vsel %vm105_vm1, %v1855_v28, %v1856_v18  ;;  %v4548_v54 = vld [vmem:[#allocation3 + $0x248] sm:$0xff]  }
 0x1e4   :  { %v1528_v24 = vld [vmem:[#allocation2 + $0x60] sm:$0xff]  ;;  %v2067_v27 = vrot.slane %v2049_v12, 1  ;;  %v2068_v39 = vrot.slane %v2051_v47, 1  ;;  %v2066_v58 = vsel %vm105_vm1, %v2064_v15, %v2065_v23  ;;  %v1871_v12 = vpack.c.bf16 %v1863_v22, %v1857_v3  ;;  %v4540_v15 = vld [vmem:[#allocation3 + $0x268] sm:$0xff]  }
 0x1e5   :  { %v1529_v43 = vld [vmem:[#allocation2 + $0x68] sm:$0xff]  ;;  %v2052_v26 = vld [vmem:[#allocation2 + $0x78] sm:$0x1]  ;;  %v1530_v30 = vpack.c.bf16 %v1528_v24, %v1526_v13  ;;  %v2273_v47 = vsel %vm2267_vm3, %v2271_v29, %v2272_v33  ;;  %v4539_v24 = vld [vmem:[#allocation3 + $0x230] sm:$0xff]  }
 0x1e6   :  { %v2050_v51 = vld [vmem:[#allocation2 + $0x68] sm:$0xfe]  ;;  %v1531_v46 = vpack.c.bf16 %v1529_v43, %v1527_v63  ;;  %v2071_v48 = vrot.slane %v2052_v26, 1  ;;  %v2069_v52 = vsel %vm105_vm1, %v2067_v27, %v2068_v39  ;;  %v2285_v63 = vpack.c.bf16 %v2279_v19, %v2273_v47  ;;  %v4542_v27 = vld [vmem:[#allocation3 + $0x260] sm:$0xff]   ;;  %v4544_v43 = vld [vmem:[#allocation3 + $0x258] sm:$0xff]  }
 0x1e7   :  { %v2070_v59 = vrot.slane %v2050_v51, 1  ;;  %v2077_v34 = vpack.c.bf16 %v2069_v52, %v2063_v5  ;;  %v4541_v23 = vld [vmem:[#allocation3 + $0x228] sm:$0xff]   ;;  %v4543_v39 = vld [vmem:[#allocation3 + $0x220] sm:$0xff]   ;;  %v4546_v51 = vld [vmem:[#allocation3 + $0x250] sm:$0xff]  }
 0x1e8   :  { %1693 = vmatprep.mubr.bf16.mxu0 %v1531_v46  ;;  %v4547_v26 = vld [vmem:[#allocation3 + $0x210] sm:$0xff]   ;;  %v2255_v46 = vld [vmem:[#allocation2 + $0x40] sm:$0xfc]  ;;  %v4564_v49 = vld [vmem:[#allocation6 + $0x48] sm:$0xff]  }
 0x1e9   :  { %v2072_v62 = vsel %vm105_vm1, %v2070_v59, %v2071_v48  ;;  %1694 = vmatmul.mubr.bf16.vlgmr.msra.gmra.mxu0 %v1530_v30  ;;  %v2257_v13 = vld [vmem:[#allocation2 + $0x50] sm:$0x3]  ;;  %v4550_v59 = vld [vmem:[#allocation3 + $0x240] sm:$0xff]   ;;  %v2274_v61 = vrot.slane %v2255_v46, 2 }
 0x1ea   :  { %v2078_v1 = vpack.c.bf16 %v2072_v62, %v2066_v58  ;;  %3959 = vmatpush3.bf16.msra.mxu0 %v4520_v56  ;;  %2034 = vmatprep.mubr.bf16.mxu0 %v1872_v32  ;;  %v4549_v56 = vld [vmem:[#allocation3 + $0x208] sm:$0xff]   ;;  %v2251_v48 = vld [vmem:[#allocation2] sm:$0xfc]  ;;  %v2253_v30 = vld [vmem:[#allocation2 + $0x10] sm:$0x3] }
 0x1eb   :  { %3960 = vmatprep.subr.bf16.mxu0 %v4522_v50  ;;  %v2275_v50 = vrot.slane %v2257_v13, 2  ;;  %v4551_v52 = vld [vmem:[#allocation3 + $0x200] sm:$0xff]   ;;  %v2268_v32 = vrot.slane %v2251_v48, 2  ;;  %v2269_v58 = vrot.slane %v2253_v30, 2 }
 0x1ec   :  { %2240 = vmatprep.mubr.bf16.mxu1 %v2078_v1  ;;  %v4567_v44 = vld [vmem:[#allocation6] sm:$0xff]  }
 0x1ed   :  { %2241 = vmatmul.mubr.bf16.vlgmr.msra.gmra.mxu1 %v2077_v34  ;;  %v2276_v62 = vsel %vm2267_vm3, %v2274_v61, %v2275_v50  ;;  %v2270_v1 = vsel %vm2267_vm3, %v2268_v32, %v2269_v58  ;;  %v4552_v34 = vld [vmem:[#allocation6 + $0x78] sm:$0xff]  }
 0x1ee   :  { %3961 = vmatpush3.bf16.msra.mxu0 %v4523_v9  ;;  %v2284_v5 = vpack.c.bf16 %v2276_v62, %v2270_v1  ;;  %v4553_v9 = vld [vmem:[#allocation6 + $0x38] sm:$0xff]   ;;  %4106 = vmatpush3.bf16.msra.mxu1 %v4552_v34 }
 0x1ef   :  { %3962 = vmatprep.subr.bf16.mxu0 %v4524_v40  ;;  %v4554_v40 = vld [vmem:[#allocation6 + $0x70] sm:$0xff]   ;;  %4107 = vmatprep.subr.bf16.mxu1 %v4744_v21 }
 0x1f0   :  { %4121 = vmatprep.mubr.msk.bf16.mxu1 %vm4745_vm4, %v4744_v21 }
 0x1f2   :  { %3963 = vmatpush3.bf16.msra.mxu0 %v4525_v4  ;;  %v4555_v4 = vld [vmem:[#allocation6 + $0x30] sm:$0xff]   ;;  %4108 = vmatpush3.bf16.msra.mxu1 %v4554_v40  ;;  %v4568_v40 = vld [vmem:[#allocation6 + $0xb8] sm:$0xff]  }
 0x1f3   :  { %3964 = vmatprep.subr.bf16.mxu0 %v4526_v53  ;;  %v4556_v53 = vld [vmem:[#allocation6 + $0x68] sm:$0xff]   ;;  %4109 = vmatprep.subr.bf16.mxu1 %v4744_v21 }
 0x1f6   :  { %3965 = vmatpush3.bf16.msra.mxu0 %v4527_v55  ;;  %4110 = vmatpush3.bf16.msra.mxu1 %v4556_v53  ;;  %v4557_v55 = vld [vmem:[#allocation6 + $0x28] sm:$0xff]  }
 0x1f7   :  { %3966 = vmatprep.subr.bf16.mxu0 %v4528_v60  ;;  %4111 = vmatprep.subr.bf16.mxu1 %v4744_v21  ;;  %v4558_v60 = vld [vmem:[#allocation6 + $0x60] sm:$0xff]  }
 0x1fa   :  { %3967 = vmatpush3.bf16.msra.mxu0 %v4529_v31  ;;  %4112 = vmatpush3.bf16.msra.mxu1 %v4558_v60  ;;  %v4559_v31 = vld [vmem:[#allocation6 + $0x20] sm:$0xff]  }
 0x1fb   :  { %3968 = vmatprep.subr.bf16.mxu0 %v4530_v35  ;;  %4113 = vmatprep.subr.bf16.mxu1 %v4744_v21  ;;  %v4560_v35 = vld [vmem:[#allocation6 + $0x58] sm:$0xff]  }
 0x1fe   :  { %3969 = vmatpush3.bf16.msra.mxu0 %v4531_v11  ;;  %4114 = vmatpush3.bf16.msra.mxu1 %v4560_v35  ;;  %v4561_v11 = vld [vmem:[#allocation6 + $0x18] sm:$0xff]  }
 0x1ff   :  { %3970 = vmatprep.subr.bf16.mxu0 %v4532_v36  ;;  %4115 = vmatprep.subr.bf16.mxu1 %v4744_v21  ;;  %v4562_v36 = vld [vmem:[#allocation6 + $0x50] sm:$0xff]  }
 0x202   :  { %3971 = vmatpush3.bf16.msra.mxu0 %v4533_v38  ;;  %4116 = vmatpush3.bf16.msra.mxu1 %v4562_v36  ;;  %v4565_v38 = vld [vmem:[#allocation6 + $0x8] sm:$0xff]   ;;  %v4569_v36 = vld [vmem:[#allocation6 + $0xf8] sm:$0xff]  }
 0x203   :  { %3972 = vmatprep.subr.bf16.mxu0 %v4534_v37  ;;  %4117 = vmatprep.subr.bf16.mxu1 %v4744_v21 }
 0x206   :  { %3973 = vmatpush3.bf16.msra.mxu0 %v4535_v45  ;;  %4118 = vmatpush3.bf16.msra.mxu1 %v4564_v49 }
 0x207   :  { %4002 = vmatprep.subr.bf16.mxu0 %v4536_v20  ;;  %4119 = vmatprep.subr.bf16.mxu1 %v4744_v21 }
 0x209   :  { %2035 = vmatmul.mubr.bf16.vlgmr.msra.gmra.mxu0 %v1871_v12 }
 0x20a   :  { %4003 = vmatpush3.bf16.msra.mxu0 %v4537_v7  ;;  %2447 = vmatprep.mubr.bf16.mxu0 %v2285_v63 }
 0x20b   :  { %4004 = vmatprep.subr.bf16.mxu0 %v4538_v41  ;;  %4120 = vmatpush3.bf16.msra.mxu1 %v4566_v0 }
 0x20c   :  { %4145 = vmatprep.subr.bf16.mxu1 %v4744_v21 }
 0x20e   :  { %4005 = vmatpush3.bf16.msra.mxu0 %v4539_v24 }
 0x20f   :  { %4006 = vmatprep.subr.bf16.mxu0 %v4540_v15 }
 0x212   :  { %4007 = vmatpush3.bf16.msra.mxu0 %v4541_v23 }
 0x213   :  { %4008 = vmatprep.subr.bf16.mxu0 %v4542_v27 }
 0x216   :  { %4009 = vmatpush3.bf16.msra.mxu0 %v4543_v39 }
 0x217   :  { %4010 = vmatprep.subr.bf16.mxu0 %v4544_v43 }
 0x21a   :  { %4011 = vmatpush3.bf16.msra.mxu0 %v4545_v10 }
 0x21b   :  { %4012 = vmatprep.subr.bf16.mxu0 %v4546_v51 }
 0x21e   :  { %4013 = vmatpush3.bf16.msra.mxu0 %v4547_v26  ;;  %v3835_v26 = vld [vmem:[%s5982_s6] ss:$0 sm:$0xff] }
 0x21f   :  { %4014 = vmatprep.subr.bf16.mxu0 %v4548_v54 }
 0x222   :  { %4015 = vmatpush3.bf16.msra.mxu0 %v4549_v56 }
 0x223   :  { %4016 = vmatprep.subr.bf16.mxu0 %v4550_v59 }
 0x226   :  { %4017 = vmatpush3.bf16.msra.mxu0 %v4551_v52 }
 0x227   :  { %4125 = vmatprep.subr.bf16.mxu0 %v4744_v21 }
 0x229   :  { %2448 = vmatmul.mubr.bf16.vlgmr.msra.gmra.mxu0 %v2284_v5 }
 0x22a   :  { %4126 = vmatpush3.bf16.msra.mxu0 %v4553_v9  ;;  %4141 = vmatprep.mubr.msk.bf16.mxu0 %vm4745_vm4, %v4744_v21 }
 0x22b   :  { %4127 = vmatprep.subr.bf16.mxu0 %v4744_v21 }
 0x22e   :  { %4128 = vmatpush3.bf16.msra.mxu0 %v4555_v4 }
 0x22f   :  { %4129 = vmatprep.subr.bf16.mxu0 %v4744_v21 }
 0x232   :  { %4130 = vmatpush3.bf16.msra.mxu0 %v4557_v55 }
 0x233   :  { %4131 = vmatprep.subr.bf16.mxu0 %v4744_v21 }
 0x236   :  { %4132 = vmatpush3.bf16.msra.mxu0 %v4559_v31 }
 0x237   :  { %4133 = vmatprep.subr.bf16.mxu0 %v4744_v21 }
 0x23a   :  { %4134 = vmatpush3.bf16.msra.mxu0 %v4561_v11 }
 0x23b   :  { %4135 = vmatprep.subr.bf16.mxu0 %v4744_v21 }
 0x23e   :  { %4136 = vmatpush3.bf16.msra.mxu0 %v4563_v42 }
 0x23f   :  { %4137 = vmatprep.subr.bf16.mxu0 %v4744_v21 }
 0x242   :  { %4138 = vmatpush3.bf16.msra.mxu0 %v4565_v38 }
 0x243   :  { %4139 = vmatprep.subr.bf16.mxu0 %v4744_v21 }
 0x246   :  { %4140 = vmatpush3.bf16.msra.mxu0 %v4567_v44 }
 0x247   :  { %4165 = vmatprep.subr.bf16.mxu0 %v4744_v21  ;;  %v3952_v6 = vpop.f32.mrf.mxu1 }
 0x249   :  { %v3953_v57 = vpop.f32.mrf.mxu1 }
 0x24a   :  { %v3954_v33 = vadd.f32 %v3953_v57, %v3952_v6 }
 0x24b   :  { %v3955_v25 = vpop.f32.mrf.mxu1 }
 0x24d   :  { %v3956_v8 = vpop.f32.mrf.mxu1 }
 0x24e   :  { %v3957_v47 = vadd.f32 %v3956_v8, %v3955_v25  ;;  %v4572_v25 = vld [vmem:[#allocation6 + $0xa8] sm:$0xff]   ;;  %v4574_v8 = vld [vmem:[#allocation6 + $0xa0] sm:$0xff]  }
 0x2a9   :  { %v3930_v37 = vpop.f32.mrf.mxu0 }
 0x2ab   :  { %v3931_v17 = vpop.f32.mrf.mxu0 }
 0x2ac   :  { %v3932_v20 = vadd.f32 %v3931_v17, %v3930_v37  ;;  %v4570_v17 = vld [vmem:[#allocation6 + $0xb0] sm:$0xff]  }
 0x2ad   :  { %v3933_v14 = vpop.f32.mrf.mxu0  ;;  %v3996_v28 = vpop.f32.mrf.mxu1 }
 0x2ae   :  { %v1833_v3 = vadd.f32 %v3954_v33, %v3932_v20  ;;  %v4578_v20 = vld [vmem:[#allocation6 + $0x90] sm:$0xff]   ;;  %v4580_v33 = vld [vmem:[#allocation6 + $0x88] sm:$0xff]  }
 0x2af   :  { %v3934_v16 = vpop.f32.mrf.mxu0  ;;  %v3997_v29 = vpop.f32.mrf.mxu1 }
 0x2b0   :  { %v3935_v7 = vadd.f32 %v3934_v16, %v3933_v14  ;;  %v3998_v15 = vadd.f32 %v3997_v29, %v3996_v28  ;;  %v4571_v16 = vld [vmem:[#allocation6 + $0xf0] sm:$0xff]   ;;  %v4576_v28 = vld [vmem:[#allocation6 + $0x98] sm:$0xff]  }
 0x2b1   :  { %v3999_v12 = vpop.f32.mrf.mxu1  ;;  %v4579_v29 = vld [vmem:[#allocation6 + $0xd0] sm:$0xff]  }
 0x2b2   :  { %v1836_v23 = vadd.f32 %v3957_v47, %v3935_v7  ;;  %v4583_v47 = vld [vmem:[#allocation6 + $0xc0] sm:$0xff]  }
 0x2b3   :  { %v4000_v27 = vpop.f32.mrf.mxu1 }
 0x2b4   :  { %v4001_v46 = vadd.f32 %v4000_v27, %v3999_v12  ;;  %v4585_v27 = vld [vmem:[#allocation6 + $0x178] sm:$0xff]  }
 0x2c9   :  { %v3974_v2 = vpop.f32.mrf.mxu0 }
 0x2cb   :  { %v3975_v45 = vpop.f32.mrf.mxu0 }
 0x2cc   :  { %v3976_v22 = vadd.f32 %v3975_v45, %v3974_v2  ;;  %v4573_v2 = vld [vmem:[#allocation6 + $0xe8] sm:$0xff]   ;;  %v4575_v45 = vld [vmem:[#allocation6 + $0xe0] sm:$0xff]  }
 0x2cd   :  { %v3977_v18 = vpop.f32.mrf.mxu0 }
 0x2ce   :  { %v2043_v41 = vadd.f32 %v3976_v22, %v1833_v3  ;;  %v4581_v22 = vld [vmem:[#allocation6 + $0xc8] sm:$0xff]   ;;  %v4582_v3 = vld [vmem:[#allocation6 + $0x80] sm:$0xff]  }
 0x2cf   :  { %v3978_v19 = vpop.f32.mrf.mxu0 }
 0x2d0   :  { %v3979_v63 = vadd.f32 %v3978_v19, %v3977_v18  ;;  %v2249_v10 = vadd.f32 %v3998_v15, %v2043_v41  ;;  %v4577_v18 = vld [vmem:[#allocation6 + $0xd8] sm:$0xff]  }
 0x2d2   :  { %v2044_v43 = vadd.f32 %v3979_v63, %v1836_v23 }
 0x2d4   :  { %v2250_v48 = vadd.f32 %v4001_v46, %v2044_v43  ;;  %v4586_v43 = vld [vmem:[#allocation6 + $0x130] sm:$0xff]   ;;  %v4591_v46 = vld [vmem:[#allocation6 + $0x160] sm:$0xff]  }
 0x2e9   :  { %v4018_v24 = vpop.f32.mrf.mxu0 }
 0x2eb   :  { %v4019_v39 = vpop.f32.mrf.mxu0 }
 0x2ec   :  { %v4020_v51 = vadd.f32 %v4019_v39, %v4018_v24  ;;  %v4584_v24 = vld [vmem:[#allocation6 + $0x138] sm:$0xff]  }
 0x2ed   :  { %v4021_v54 = vpop.f32.mrf.mxu0 }
 0x2ee   :  { %v2456_v13 = vadd.f32 %v4020_v51, %v2249_v10  ;;  %v4587_v10 = vld [vmem:[#allocation6 + $0x170] sm:$0xff]   ;;  %v4588_v51 = vld [vmem:[#allocation6 + $0x128] sm:$0xff]  }
 0x2ef   :  { %v4022_v56 = vpop.f32.mrf.mxu0 }
 0x2f0   :  { %v2465_v59 = vadd.f32 %v3835_v26, %v2456_v13  ;;  %v4023_v30 = vadd.f32 %v4022_v56, %v4021_v54  ;;  %v4590_v54 = vld [vmem:[#allocation6 + $0x120] sm:$0xff]   ;;  %v4592_v13 = vld [vmem:[#allocation6 + $0x118] sm:$0xff]  }
 0x2f1   :  { %v4593_v56 = vld [vmem:[#allocation6 + $0x158] sm:$0xff]  }
 0x2f2   :  { %v2467_v61 = vmax.f32 %v2465_v59, 0.0  ;;  %v2457_v50 = vadd.f32 %v4023_v30, %v2250_v48  ;;  %v4594_v59 = vld [vmem:[#allocation6 + $0x110] sm:$0xff]   ;;  %v4596_v30 = vld [vmem:[#allocation6 + $0x108] sm:$0xff]  }
 0x2f3   :  { %v4595_v48 = vld [vmem:[#allocation6 + $0x150] sm:$0xff]  }
 0x2f4   :  { %v3912_v52 = vpack.c.bf16 %v2467_v61, %v2467_v61  ;;  %v2466_v32 = vadd.f32 %v3835_v26, %v2457_v50  ;;  %v4589_v26 = vld [vmem:[#allocation6 + $0x168] sm:$0xff]   ;;  %v4598_v50 = vld [vmem:[#allocation6 + $0x100] sm:$0xff]  }
 0x2f5   :  { %v4597_v61 = vld [vmem:[#allocation6 + $0x148] sm:$0xff]  }
 0x2f6   :  { %v5831_v58 = vunpack.c.l.b16 %v3912_v52  ;;  %v2468_v62 = vmax.f32 %v2466_v32, 0.0  ;;  %v4599_v52 = vld [vmem:[#allocation6 + $0x140] sm:$0xff]   ;;  %v4600_v32 = vld [vmem:[#allocation6 + $0x1b8] sm:$0xff]  }
 0x2f8   :  { %v3913_v1 = vpack.c.bf16 %v2468_v62, %v2468_v62  ;;  %v2510_v34 = vrot.slane %v5831_v58, 1  ;;  %v2934_v53 = vrot.slane %v5831_v58, 4  ;;  %v3045_v42 = vrot.slane %v5831_v58, 5  ;;  %v4601_v62 = vld [vmem:[#allocation6 + $0x1f8] sm:$0xff]  }
 0x2f9   :  { %v3156_v49 = vrot.slane %v5831_v58, 6  ;;  %v3267_v37 = vrot.slane %v5831_v58, 7  ;;  %v2712_v7 = vrot.slane %v5831_v58, 2  ;;  %v2823_v63 = vrot.slane %v5831_v58, 3 }
 0x2fa   :  { %v5833_v5 = vunpack.c.l.b16 %v3913_v1 }
 0x2fc   :  { %v2512_v9 = vsel %vm2511_vm5, %v5833_v5, %v2510_v34  ;;  %v2603_v4 = vrot.slane %v5833_v5, 7  ;;  %v2935_v60 = vrot.slane %v5833_v5, 3  ;;  %v3046_v31 = vrot.slane %v5833_v5, 4  ;;  %v4603_v34 = vld [vmem:[#allocation6 + $0x1f0] sm:$0xff]  }
 0x2fd   :  { %v2513_v55 = vpack.c.b16 %v2512_v9, %v2512_v9  ;;  %v3157_v35 = vrot.slane %v5833_v5, 5  ;;  %v3268_v38 = vrot.slane %v5833_v5, 6  ;;  %v2713_v19 = vrot.slane %v5833_v5, 1  ;;  %v4604_v9 = vld [vmem:[#allocation6 + $0x1a8] sm:$0xff]  }
 0x2fe   :  { %v2604_v11 = vsel %vm2511_vm5, %v2603_v4, %v5831_v58  ;;  %v5849_v44 = vsel %vm2511_vm5, %v2935_v60, %v2934_v53  ;;  %v5855_v6 = vsel %vm2511_vm5, %v3046_v31, %v3045_v42  ;;  %v2824_v12 = vrot.slane %v5833_v5, 2  ;;  %v4602_v5 = vld [vmem:[#allocation6 + $0x1b0] sm:$0xff]   ;;  %v4606_v4 = vld [vmem:[#allocation6 + $0x1a0] sm:$0xff]   ;;  %v4609_v60 = vld [vmem:[#allocation6 + $0x1d8] sm:$0xff]  }
 0x2ff   :  { %4122 = vmatmul.mubr.bf16.vlgmr.msra.gmra.mxu1 %v2513_v55  ;;  %v2605_v0 = vpack.c.b16 %v2604_v11, %v2604_v11  ;;  %v5858_v14 = vsel %vm2511_vm5, %v3157_v35, %v3156_v49  ;;  %v5862_v57 = vsel %vm2511_vm5, %v3268_v38, %v3267_v37  ;;  %v2714_v41 = vsel %vm2511_vm5, %v2713_v19, %v2712_v7  ;;  %v4607_v53 = vld [vmem:[#allocation6 + $0x1e0] sm:$0xff]   ;;  %v4608_v55 = vld [vmem:[#allocation6 + $0x198] sm:$0xff]   ;;  %v4610_v31 = vld [vmem:[#allocation6 + $0x190] sm:$0xff]  }
 0x300   :  { %4146 = vmatpush3.bf16.msra.mxu1 %v4568_v40  ;;  %4161 = vmatprep.mubr.msk.bf16.mxu1 %vm4745_vm4, %v4744_v21  ;;  %v2825_v15 = vsel %vm2511_vm5, %v2824_v12, %v2823_v63  ;;  %v2715_v23 = vpack.c.b16 %v2714_v41, %v2714_v41  ;;  %v2937_v58 = vpack.c.b16 %v5849_v44, %v5849_v44  ;;  %v4605_v40 = vld [vmem:[#allocation6 + $0x1e8] sm:$0xff]   ;;  %v4611_v35 = vld [vmem:[#allocation6 + $0x1d0] sm:$0xff]   ;;  %v4614_v42 = vld [vmem:[#allocation6 + $0x180] sm:$0xff]  }
 0x301   :  { %4142 = vmatmul.mubr.bf16.vlgmr.msra.gmra.mxu0 %v2605_v0  ;;  %4147 = vmatprep.subr.bf16.mxu1 %v4744_v21  ;;  %v2826_v39 = vpack.c.b16 %v2825_v15, %v2825_v15  ;;  %v3048_v1 = vpack.c.b16 %v5855_v6, %v5855_v6  ;;  %v4612_v11 = vld [vmem:[#allocation6 + $0x188] sm:$0xff]   ;;  %v4615_v49 = vld [vmem:[#allocation6 + $0x1c0] sm:$0xff]   ;;  %v3159_v38 = vpack.c.b16 %v5858_v14, %v5858_v14  ;;  %v4616_v44 = vld [vmem:[%s5980_s4 + $0x38] sm:$0xff]  }
 0x302   :  { %4166 = vmatpush3.bf16.msra.mxu0 %v4569_v36  ;;  %4181 = vmatprep.mubr.msk.bf16.mxu0 %vm4745_vm4, %v4744_v21  ;;  %v4613_v36 = vld [vmem:[#allocation6 + $0x1c8] sm:$0xff]   ;;  %v3270_v0 = vpack.c.b16 %v5862_v57, %v5862_v57  ;;  %v4617_v37 = vld [vmem:[%s5980_s4 + $0x30] sm:$0xff]   ;;  %v4619_v6 = vld [vmem:[%s5980_s4 + $0x20] sm:$0xff]  }
 0x303   :  { %4167 = vmatprep.subr.bf16.mxu0 %v4744_v21  ;;  %v4620_v14 = vld [vmem:[%s5980_s4 + $0x18] sm:$0xff]   ;;  %v4621_v57 = vld [vmem:[%s5980_s4 + $0x10] sm:$0xff]  }
 0x304   :  { %4148 = vmatpush3.bf16.msra.mxu1 %v4570_v17  ;;  %v4618_v17 = vld [vmem:[%s5980_s4 + $0x28] sm:$0xff]  }
 0x305   :  { %4149 = vmatprep.subr.bf16.mxu1 %v4744_v21 }
 0x306   :  { %4168 = vmatpush3.bf16.msra.mxu0 %v4571_v16  ;;  %v4622_v16 = vld [vmem:[%s5980_s4 + $0x8] sm:$0xff]  }
 0x307   :  { %4169 = vmatprep.subr.bf16.mxu0 %v4744_v21 }
 0x308   :  { %4150 = vmatpush3.bf16.msra.mxu1 %v4572_v25  ;;  %v4623_v25 = vld [vmem:[%s5980_s4] sm:$0xff]  }
 0x309   :  { %4151 = vmatprep.subr.bf16.mxu1 %v4744_v21 }
 0x30a   :  { %4170 = vmatpush3.bf16.msra.mxu0 %v4573_v2 }
 0x30b   :  { %4171 = vmatprep.subr.bf16.mxu0 %v4744_v21 }
 0x30c   :  { %4152 = vmatpush3.bf16.msra.mxu1 %v4574_v8 }
 0x30d   :  { %4153 = vmatprep.subr.bf16.mxu1 %v4744_v21 }
 0x30e   :  { %4172 = vmatpush3.bf16.msra.mxu0 %v4575_v45 }
 0x30f   :  { %4173 = vmatprep.subr.bf16.mxu0 %v4744_v21 }
 0x310   :  { %4154 = vmatpush3.bf16.msra.mxu1 %v4576_v28 }
 0x311   :  { %4155 = vmatprep.subr.bf16.mxu1 %v4744_v21 }
 0x312   :  { %4174 = vmatpush3.bf16.msra.mxu0 %v4577_v18 }
 0x313   :  { %4175 = vmatprep.subr.bf16.mxu0 %v4744_v21 }
 0x314   :  { %4156 = vmatpush3.bf16.msra.mxu1 %v4578_v20 }
 0x315   :  { %4157 = vmatprep.subr.bf16.mxu1 %v4744_v21 }
 0x316   :  { %4176 = vmatpush3.bf16.msra.mxu0 %v4579_v29 }
 0x317   :  { %4177 = vmatprep.subr.bf16.mxu0 %v4744_v21 }
 0x318   :  { %4158 = vmatpush3.bf16.msra.mxu1 %v4580_v33 }
 0x319   :  { %4159 = vmatprep.subr.bf16.mxu1 %v4744_v21 }
 0x31a   :  { %4178 = vmatpush3.bf16.msra.mxu0 %v4581_v22 }
 0x31b   :  { %4179 = vmatprep.subr.bf16.mxu0 %v4744_v21 }
 0x31c   :  { %4160 = vmatpush3.bf16.msra.mxu1 %v4582_v3 }
 0x31d   :  { %4185 = vmatprep.subr.bf16.mxu1 %v4744_v21 }
 0x31e   :  { %4180 = vmatpush3.bf16.msra.mxu0 %v4583_v47 }
 0x31f   :  { %4162 = vmatmul.mubr.bf16.vlgmr.msra.gmra.mxu1 %v2715_v23  ;;  %4205 = vmatprep.subr.bf16.mxu0 %v4744_v21 }
 0x320   :  { %4186 = vmatpush3.bf16.msra.mxu1 %v4584_v24  ;;  %4201 = vmatprep.mubr.msk.bf16.mxu1 %vm4745_vm4, %v4744_v21 }
 0x321   :  { %4182 = vmatmul.mubr.bf16.vlgmr.msra.gmra.mxu0 %v2826_v39  ;;  %4187 = vmatprep.subr.bf16.mxu1 %v4744_v21 }
 0x322   :  { %4206 = vmatpush3.bf16.msra.mxu0 %v4585_v27  ;;  %4221 = vmatprep.mubr.msk.bf16.mxu0 %vm4745_vm4, %v4744_v21 }
 0x323   :  { %4207 = vmatprep.subr.bf16.mxu0 %v4744_v21 }
 0x324   :  { %4188 = vmatpush3.bf16.msra.mxu1 %v4586_v43 }
 0x325   :  { %4189 = vmatprep.subr.bf16.mxu1 %v4744_v21 }
 0x326   :  { %4208 = vmatpush3.bf16.msra.mxu0 %v4587_v10 }
 0x327   :  { %4209 = vmatprep.subr.bf16.mxu0 %v4744_v21 }
 0x328   :  { %4190 = vmatpush3.bf16.msra.mxu1 %v4588_v51 }
 0x329   :  { %4191 = vmatprep.subr.bf16.mxu1 %v4744_v21 }
 0x32a   :  { %4210 = vmatpush3.bf16.msra.mxu0 %v4589_v26 }
 0x32b   :  { %4211 = vmatprep.subr.bf16.mxu0 %v4744_v21 }
 0x32c   :  { %4192 = vmatpush3.bf16.msra.mxu1 %v4590_v54 }
 0x32d   :  { %4193 = vmatprep.subr.bf16.mxu1 %v4744_v21 }
 0x32e   :  { %4212 = vmatpush3.bf16.msra.mxu0 %v4591_v46 }
 0x32f   :  { %4213 = vmatprep.subr.bf16.mxu0 %v4744_v21 }
 0x330   :  { %4194 = vmatpush3.bf16.msra.mxu1 %v4592_v13 }
 0x331   :  { %4195 = vmatprep.subr.bf16.mxu1 %v4744_v21 }
 0x332   :  { %4214 = vmatpush3.bf16.msra.mxu0 %v4593_v56 }
 0x333   :  { %4215 = vmatprep.subr.bf16.mxu0 %v4744_v21 }
 0x334   :  { %4196 = vmatpush3.bf16.msra.mxu1 %v4594_v59 }
 0x335   :  { %4197 = vmatprep.subr.bf16.mxu1 %v4744_v21 }
 0x336   :  { %4216 = vmatpush3.bf16.msra.mxu0 %v4595_v48 }
 0x337   :  { %4217 = vmatprep.subr.bf16.mxu0 %v4744_v21 }
 0x338   :  { %4198 = vmatpush3.bf16.msra.mxu1 %v4596_v30 }
 0x339   :  { %4199 = vmatprep.subr.bf16.mxu1 %v4744_v21 }
 0x33a   :  { %4218 = vmatpush3.bf16.msra.mxu0 %v4597_v61  ;;  %v3902_v61 = vld [vmem:[%s5983_s7] ss:$0 sm:$0xff]  ;;  %s4746_s7 = smov [#allocation8]  }
 0x33b   :  { %4219 = vmatprep.subr.bf16.mxu0 %v4744_v21  ;;  %s3491_s18 = sshll.u32 %s4746_s7, 4  ;;  %s3492_s18 = int_to_ptr.vmem [resolvable:$true] %s3491_s18 }
 0x33c   :  { %4200 = vmatpush3.bf16.msra.mxu1 %v4598_v50  ;;  %s4714_s19 = scalar_lea.vmem %s3492_s18, 32  ;;  %p4719_p11 = scmp.lt.s32.totalorder %s3492_s18, %s3492_s18 }
 0x33d   :  { %4225 = vmatprep.subr.bf16.mxu1 %v4744_v21  ;;  %p4715_p10 = scmp.ne.s32.totalorder %s3492_s18, %s4714_s19  ;;  %p4720_p12 = scmp.lt.s32.totalorder %s4714_s19, %s4714_s19 }
 0x33e   :  { %4220 = vmatpush3.bf16.msra.mxu0 %v4599_v52 }
 0x33f   :  { %4202 = vmatmul.mubr.bf16.vlgmr.msra.gmra.mxu1 %v2937_v58  ;;  %4245 = vmatprep.subr.bf16.mxu0 %v4744_v21  ;;  %p4721_p13 = por %p4720_p12, %p4719_p11 }
 0x340   :  { %4226 = vmatpush3.bf16.msra.mxu1 %v4600_v32  ;;  %4241 = vmatprep.mubr.msk.bf16.mxu1 %vm4745_vm4, %v4744_v21 }
 0x341   :  { %4222 = vmatmul.mubr.bf16.vlgmr.msra.gmra.mxu0 %v3048_v1  ;;  %4227 = vmatprep.subr.bf16.mxu1 %v4744_v21  ;;  %p4722_p0 = pnand %p4721_p13, %p4715_p10 }
 0x342   :  { %4246 = vmatpush3.bf16.msra.mxu0 %v4601_v62  ;;  %4261 = vmatprep.mubr.msk.bf16.mxu0 %vm4745_vm4, %v4744_v21 }
 0x343   :  { %4247 = vmatprep.subr.bf16.mxu0 %v4744_v21 }
 0x344   :  { %4228 = vmatpush3.bf16.msra.mxu1 %v4602_v5 }
 0x345   :  { %4229 = vmatprep.subr.bf16.mxu1 %v4744_v21 }
 0x346   :  { %4248 = vmatpush3.bf16.msra.mxu0 %v4603_v34 }
 0x347   :  { %4249 = vmatprep.subr.bf16.mxu0 %v4744_v21 }
 0x348   :  { %4230 = vmatpush3.bf16.msra.mxu1 %v4604_v9 }
 0x349   :  { %4231 = vmatprep.subr.bf16.mxu1 %v4744_v21 }
 0x34a   :  { %4250 = vmatpush3.bf16.msra.mxu0 %v4605_v40  ;;  %v3903_v40 = vld [vmem:[%s5984_s8] ss:$0 sm:$0xff] }
 0x34b   :  { %4251 = vmatprep.subr.bf16.mxu0 %v4744_v21 }
 0x34c   :  { %4232 = vmatpush3.bf16.msra.mxu1 %v4606_v4 }
 0x34d   :  { %4233 = vmatprep.subr.bf16.mxu1 %v4744_v21 }
 0x34e   :  { %4252 = vmatpush3.bf16.msra.mxu0 %v4607_v53 }
 0x34f   :  { %4253 = vmatprep.subr.bf16.mxu0 %v4744_v21 }
 0x350   :  { %4234 = vmatpush3.bf16.msra.mxu1 %v4608_v55 }
 0x351   :  { %4235 = vmatprep.subr.bf16.mxu1 %v4744_v21 }
 0x352   :  { %4254 = vmatpush3.bf16.msra.mxu0 %v4609_v60 }
 0x353   :  { %4255 = vmatprep.subr.bf16.mxu0 %v4744_v21 }
 0x354   :  { %4236 = vmatpush3.bf16.msra.mxu1 %v4610_v31 }
 0x355   :  { %4237 = vmatprep.subr.bf16.mxu1 %v4744_v21 }
 0x356   :  { %4256 = vmatpush3.bf16.msra.mxu0 %v4611_v35 }
 0x357   :  { %4257 = vmatprep.subr.bf16.mxu0 %v4744_v21 }
 0x358   :  { %4238 = vmatpush3.bf16.msra.mxu1 %v4612_v11 }
 0x359   :  { %4239 = vmatprep.subr.bf16.mxu1 %v4744_v21 }
 0x35a   :  { %4258 = vmatpush3.bf16.msra.mxu0 %v4613_v36 }
 0x35b   :  { %4259 = vmatprep.subr.bf16.mxu0 %v4744_v21 }
 0x35c   :  { %4240 = vmatpush3.bf16.msra.mxu1 %v4614_v42 }
 0x35d   :  { %4265 = vmatprep.subr.bf16.mxu1 %v4744_v21 }
 0x35e   :  { %4260 = vmatpush3.bf16.msra.mxu0 %v4615_v49 }
 0x35f   :  { %4242 = vmatmul.mubr.bf16.vlgmr.msra.gmra.mxu1 %v3159_v38 }
 0x360   :  { %4281 = vmatprep.mubr.msk.bf16.mxu1 %vm4745_vm4, %v4744_v21  ;;  %4266 = vmatpush3.bf16.msra.mxu1 %v4616_v44 }
 0x361   :  { %4262 = vmatmul.mubr.bf16.vlgmr.msra.gmra.mxu0 %v3270_v0  ;;  %4267 = vmatprep.subr.bf16.mxu1 %v4744_v21 }
 0x364   :  { %4268 = vmatpush3.bf16.msra.mxu1 %v4617_v37 }
 0x365   :  { %4269 = vmatprep.subr.bf16.mxu1 %v4744_v21 }
 0x368   :  { %4270 = vmatpush3.bf16.msra.mxu1 %v4618_v17 }
 0x369   :  { %4271 = vmatprep.subr.bf16.mxu1 %v4744_v21 }
 0x36c   :  { %4272 = vmatpush3.bf16.msra.mxu1 %v4619_v6 }
 0x36d   :  { %4273 = vmatprep.subr.bf16.mxu1 %v4744_v21 }
 0x370   :  { %4274 = vmatpush3.bf16.msra.mxu1 %v4620_v14 }
 0x371   :  { %4275 = vmatprep.subr.bf16.mxu1 %v4744_v21 }
 0x374   :  { %4276 = vmatpush3.bf16.msra.mxu1 %v4621_v57 }
 0x375   :  { %4277 = vmatprep.subr.bf16.mxu1 %v4744_v21 }
 0x378   :  { %4278 = vmatpush3.bf16.msra.mxu1 %v4622_v16 }
 0x379   :  { %4279 = vmatprep.subr.bf16.mxu1 %v4744_v21 }
 0x37c   :  { %4280 = vmatpush3.bf16.msra.mxu1 %v4623_v25 }
 0x3bf   :  { %v2597_v2 = vpop.f32.mrf.mxu1 }
 0x3c1   :  { %v4123_v8 = vpop.f32.mrf.mxu1  ;;  %v2689_v45 = vpop.f32.mrf.mxu0 }
 0x3c2   :  { %v2690_v28 = vadd.f32 %v2689_v45, %v2597_v2 }
 0x3c3   :  { %v2600_v18 = vpop.f32.mrf.mxu1  ;;  %v4143_v20 = vpop.f32.mrf.mxu0 }
 0x3c5   :  { %v4124_v29 = vpop.f32.mrf.mxu1  ;;  %v2692_v33 = vpop.f32.mrf.mxu0 }
 0x3c7   :  { %v4144_v22 = vpop.f32.mrf.mxu0 }
 0x3df   :  { %v2799_v19 = vpop.f32.mrf.mxu1 }
 0x3e0   :  { %v2805_v26 = vadd.f32 %v2799_v19, %v2690_v28 }
 0x3e1   :  { %v4163_v3 = vpop.f32.mrf.mxu1  ;;  %v2910_v7 = vpop.f32.mrf.mxu0 }
 0x3e2   :  { %v2916_v54 = vadd.f32 %v2910_v7, %v2805_v26 }
 0x3e3   :  { %v2802_v12 = vpop.f32.mrf.mxu1  ;;  %v4183_v47 = vpop.f32.mrf.mxu0 }
 0x3e5   :  { %v4164_v41 = vpop.f32.mrf.mxu1  ;;  %v2913_v63 = vpop.f32.mrf.mxu0 }
 0x3e7   :  { %v4184_v24 = vpop.f32.mrf.mxu0 }
 0x3ff   :  { %v3021_v15 = vpop.f32.mrf.mxu1 }
 0x400   :  { %v3027_v46 = vadd.f32 %v3021_v15, %v2916_v54 }
 0x401   :  { %v4203_v21 = vpop.f32.mrf.mxu1  ;;  %v3132_v23 = vpop.f32.mrf.mxu0 }
 0x402   :  { %v3138_v13 = vadd.f32 %v3132_v23, %v3027_v46 }
 0x403   :  { %v3024_v27 = vpop.f32.mrf.mxu1  ;;  %v4223_v39 = vpop.f32.mrf.mxu0 }
 0x405   :  { %v4204_v43 = vpop.f32.mrf.mxu1  ;;  %v3135_v10 = vpop.f32.mrf.mxu0 }
 0x407   :  { %v4224_v51 = vpop.f32.mrf.mxu0 }
 0x41f   :  { %v3243_v56 = vpop.f32.mrf.mxu1 }
 0x420   :  { %v3249_v59 = vadd.f32 %v3243_v56, %v3138_v13 }
 0x421   :  { %v4243_v48 = vpop.f32.mrf.mxu1  ;;  %v3354_v30 = vpop.f32.mrf.mxu0 }
 0x422   :  { %v3360_v50 = vadd.f32 %v3354_v30, %v3249_v59 }
 0x423   :  { %v3246_v52 = vpop.f32.mrf.mxu1  ;;  %v4263_v32 = vpop.f32.mrf.mxu0 }
 0x424   :  { %v3368_v58 = vadd.f32 %v3902_v61, %v3360_v50 }
 0x425   :  { %v4244_v62 = vpop.f32.mrf.mxu1  ;;  %v3357_v1 = vpop.f32.mrf.mxu0 }
 0x426   :  { %v3369_v5 = vmax.f32 %v3368_v58, 0.0 }
 0x427   :  { %v4264_v34 = vpop.f32.mrf.mxu0 }
 0x428   :  { %v3370_v9 = vpack.c.bf16 %v3369_v5, %v3369_v5 }
 0x42a   :  { %4282 = vmatmul.mubr.bf16.vlgmr.msra.gmra.mxu1 %v3370_v9 }
 0x4ea   :  { %v3476_v4 = vpop.f32.mrf.mxu1 }
 0x4eb   :  { %v3477_v53 = vadd.f32 %v3903_v40, %v3476_v4 }
 0x4ec   :  { %v4283_v55 = vpop.f32.mrf.mxu1 }
 0x4ed   :  { %4624 = vtanh.f32 %v3477_v53 }
 0x4ee   :  { %v3479_v60 = vpop.f32.mrf.mxu1 }
 0x4f0   :  { %v4284_v31 = vpop.f32.mrf.mxu1 }
 0x4fa   :  { %v4625_v35 = vpop.eup %4624 }
 0x4fb   :  { %v3483_v11 = vmul.f32 2.0, %v4625_v35 }
 0x4fd   :  { %3484 = vst [vmem:[#allocation8] sm:$0x3] %v3483_v11 }
 0x4fe   :  { %4725 = shalt.err (!%p4722_p0)
}
 0x4ff   :  { %3494 = dma.vmem_to_hbm [thread:$0]  %s3492_s18, 32, %s5985_s9, [#allocation5]  }
 0x500   :  { %4738 = dma.done.wait [#allocation5], 32  }
 0x501   :  { %4739 = vsyncadd [#allocation5], 4294967264 }
 0x502   :  { %3498 = vsyncpa [#allocation4], 1 }
 0x503   :  { %3499 = vsyncpa [#allocation7], 1 }
 0x504   :  { %3500 = vsyncpa [#allocation5], 1 }

</bundles_post_ra>
